<compile_context>
chip_gen: v7x
topology: tpu7x:2x2x1
jax: 0.10.0
libtpu: 0.0.40
codegen_flags: <defaults>
</compile_context>

<pallas_src>
import functools

import jax
import jax.numpy as jnp
from jax.experimental import pallas as pl
from jax.experimental.pallas import tpu as pltpu

# ---- "config" (synthetic, deterministic) -----------------------------------
CONFIG = {
    "GRU": {
        "input_size": 16,
        "hidden_size": 32,
        "num_layers": 2,
        "num_classes": 10,
    }
}


# ---- fused Pallas kernel -----------------------------------------------------
def fused_gru_kernel(*refs, T, B, H, num_layers):
    """Whole model in one kernel.

    refs layout (all VMEM):
      refs[0]                      : x, time-major flattened (T*B, D_in) f32
      refs[1 + 4*l .. 4 + 4*l]     : per layer l:
          wih_ref : (3, D_in_l, H)   per-gate input weights (r, z, n)
          whh_ref : (3, H, H)        per-gate recurrent weights (r, z, n)
          brz_ref : (2, 1, H)        combined biases [b_ir+b_hr, b_iz+b_hz]
          bn_ref  : (2, 1, H)        [b_in, b_hn]  (b_hn must be scaled by r)
      refs[1 + 4*L]                : fc_w_t (H, C)
      refs[2 + 4*L]                : fc_b   (1, C)
      refs[3 + 4*L]                : out    (B, C)          <- output
      refs[4 + 4*L]                : seq    (T*B, H)        <- VMEM scratch
    """
    x_ref = refs[0]
    layer_refs = [refs[1 + 4 * l: 5 + 4 * l] for l in range(num_layers)]
    fcw_ref = refs[1 + 4 * num_layers]
    fcb_ref = refs[2 + 4 * num_layers]
    out_ref = refs[3 + 4 * num_layers]
    seq_ref = refs[4 + 4 * num_layers]

    h = jnp.zeros((B, H), jnp.float32)

    for l in range(num_layers):
        wih_ref, whh_ref, brz_ref, bn_ref = layer_refs[l]

        # Layer input sequence, time-major flattened: row t*B + b == x[b, t, :].
        x_flat = x_ref[...] if l == 0 else seq_ref[...]          # (T*B, Din)

        # Per-gate weights / biases (hoisted out of the time loop).
        wih_r, wih_z, wih_n = wih_ref[0], wih_ref[1], wih_ref[2]  # (Din, H)
        whh_r, whh_z, whh_n = whh_ref[0], whh_ref[1], whh_ref[2]  # (H, H)
        b_r, b_z = brz_ref[0], brz_ref[1]                         # (1, H) combined
        bih_n, bhh_n = bn_ref[0], bn_ref[1]                       # (1, H)

        # Hoisted input projection: one matmul per gate over all timesteps.
        gi_r = jnp.dot(x_flat, wih_r, preferred_element_type=jnp.float32) + b_r
        gi_z = jnp.dot(x_flat, wih_z, preferred_element_type=jnp.float32) + b_z
        gi_n = jnp.dot(x_flat, wih_n, preferred_element_type=jnp.float32) + bih_n

        h = jnp.zeros((B, H), jnp.float32)
        is_last_layer = (l == num_layers - 1)

        # Fully unrolled recurrence (T is a small static constant).
        for t in range(T):
            gh_r = jnp.dot(h, whh_r, preferred_element_type=jnp.float32)
            gh_z = jnp.dot(h, whh_z, preferred_element_type=jnp.float32)
            gh_n = jnp.dot(h, whh_n, preferred_element_type=jnp.float32) + bhh_n

            r = jax.nn.sigmoid(gi_r[t * B:(t + 1) * B] + gh_r)
            z = jax.nn.sigmoid(gi_z[t * B:(t + 1) * B] + gh_z)
            n = jnp.tanh(gi_n[t * B:(t + 1) * B] + r * gh_n)
            h = (1.0 - z) * n + z * h

            # Only the non-final layers need the full hidden sequence.
            if not is_last_layer:
                seq_ref[t * B:(t + 1) * B, :] = h

    # FC on the last layer's last-timestep hidden state.
    out_ref[...] = (
        jnp.dot(h, fcw_ref[...], preferred_element_type=jnp.float32) + fcb_ref[...]
    )


# ---- wrapper -----------------------------------------------------------------
def gru_model(x, kparams, *, hidden, num_layers):
    """Equivalent of GRU.forward: stacked GRUs, then Linear on last timestep."""
    B, T, Din = x.shape
    C = kparams["fc_w_t"].shape[1]

    # Host-side layout plumbing: (B, T, D) -> time-major flattened (T*B, D).
    x_tm = jnp.transpose(x, (1, 0, 2)).reshape(T * B, Din)

    args = [x_tm]
    for layer in kparams["layers"]:
        args.extend(layer)                       # wih_g, whh_g, brz, bn
    args.extend([kparams["fc_w_t"], kparams["fc_b"]])

    vmem = pl.BlockSpec(memory_space=pltpu.MemorySpace.VMEM)
    kernel = functools.partial(
        fused_gru_kernel, T=T, B=B, H=hidden, num_layers=num_layers
    )
    return pl.pallas_call(
        kernel,
        out_shape=jax.ShapeDtypeStruct((B, C), jnp.float32),
        in_specs=[vmem] * len(args),
        out_specs=vmem,
        scratch_shapes=[pltpu.VMEM((T * B, hidden), jnp.float32)],
    )(*args)


# ---- pure-JAX reference (torch-layout weights, for correctness check) --------
def gru_model_ref(x, torch_params):
    h_seq = x
    for (wih, whh, bih, bhh) in torch_params["layers"]:
        B, T, _ = h_seq.shape
        H = whh.shape[1]
        h = jnp.zeros((B, H), jnp.float32)
        outs = []
        for t in range(T):
            x_t = h_seq[:, t, :]
            gi = x_t @ wih.T + bih
            gh = h @ whh.T + bhh
            r = jax.nn.sigmoid(gi[:, 0:H] + gh[:, 0:H])
            z = jax.nn.sigmoid(gi[:, H:2 * H] + gh[:, H:2 * H])
            n = jnp.tanh(gi[:, 2 * H:3 * H] + r * gh[:, 2 * H:3 * H])
            h = (1.0 - z) * n + z * h
            outs.append(h)
        h_seq = jnp.stack(outs, axis=1)
    return h_seq[:, -1, :] @ torch_params["fc_w"].T + torch_params["fc_b"]


# ---- deterministic parameter init (torch shapes / init ranges) ---------------
def init_params(key, cfg):
    D = cfg["GRU"]["input_size"]
    H = cfg["GRU"]["hidden_size"]
    L = cfg["GRU"]["num_layers"]
    C = cfg["GRU"]["num_classes"]
    k = 1.0 / jnp.sqrt(jnp.float32(H))

    torch_layers = []
    kernel_layers = []
    din = D
    for _ in range(L):
        key, k1, k2, k3, k4 = jax.random.split(key, 5)
        wih = jax.random.uniform(k1, (3 * H, din), jnp.float32, -k, k)  # torch weight_ih
        whh = jax.random.uniform(k2, (3 * H, H), jnp.float32, -k, k)    # torch weight_hh
        bih = jax.random.uniform(k3, (3 * H,), jnp.float32, -k, k)
        bhh = jax.random.uniform(k4, (3 * H,), jnp.float32, -k, k)
        torch_layers.append((wih, whh, bih, bhh))

        # Kernel layout: per-gate transposed weights, pre-combined r/z biases.
        wih_g = jnp.stack([wih[0:H].T, wih[H:2 * H].T, wih[2 * H:3 * H].T])  # (3, din, H)
        whh_g = jnp.stack([whh[0:H].T, whh[H:2 * H].T, whh[2 * H:3 * H].T])  # (3, H, H)
        brz = jnp.stack([
            (bih[0:H] + bhh[0:H])[None, :],
            (bih[H:2 * H] + bhh[H:2 * H])[None, :],
        ])                                                                   # (2, 1, H)
        bn = jnp.stack([
            bih[2 * H:3 * H][None, :],
            bhh[2 * H:3 * H][None, :],
        ])                                                                   # (2, 1, H)
        kernel_layers.append((wih_g, whh_g, brz, bn))
        din = H

    key, k5, k6 = jax.random.split(key, 3)
    fc_w = jax.random.uniform(k5, (C, H), jnp.float32, -k, k)
    fc_b = jax.random.uniform(k6, (C,), jnp.float32, -k, k)

    torch_params = {"layers": torch_layers, "fc_w": fc_w, "fc_b": fc_b}
    kernel_params = {"layers": kernel_layers, "fc_w_t": fc_w.T, "fc_b": fc_b[None, :]}
    return torch_params, kernel_params


# ---- main ---------------------------------------------------------------------
if __name__ == "__main__":
    B, T = 2, 8
    cfg = CONFIG
    key = jax.random.PRNGKey(0)
    key, kx, kp = jax.random.split(key, 3)

    x = jax.random.normal(kx, (B, T, cfg["GRU"]["input_size"]), jnp.float32)
    torch_params, kernel_params = init_params(kp, cfg)

    out = jax.block_until_ready(
        gru_model(
            x,
            kernel_params,
            hidden=cfg["GRU"]["hidden_size"],
            num_layers=cfg["GRU"]["num_layers"],
        )
    )
    ref = jax.block_until_ready(gru_model_ref(x, torch_params))

    assert out.shape == (B, cfg["GRU"]["num_classes"])
    assert jnp.allclose(out, ref, atol=1e-4, rtol=1e-4), "mismatch vs reference"
    print("KERNEL_OK")
</pallas_src>

<mosaic_0001>
module attributes {stable_mosaic.version = 11 : i64} {
  func.func @fused_gru_kernel(%arg0: memref<16x16xf32, #tpu.memory_space<vmem>>, %arg1: memref<3x16x32xf32, #tpu.memory_space<vmem>>, %arg2: memref<3x32x32xf32, #tpu.memory_space<vmem>>, %arg3: memref<2x1x32xf32, #tpu.memory_space<vmem>>, %arg4: memref<2x1x32xf32, #tpu.memory_space<vmem>>, %arg5: memref<3x32x32xf32, #tpu.memory_space<vmem>>, %arg6: memref<3x32x32xf32, #tpu.memory_space<vmem>>, %arg7: memref<2x1x32xf32, #tpu.memory_space<vmem>>, %arg8: memref<2x1x32xf32, #tpu.memory_space<vmem>>, %arg9: memref<32x10xf32, #tpu.memory_space<vmem>>, %arg10: memref<1x10xf32, #tpu.memory_space<vmem>>, %arg11: memref<2x10xf32, #tpu.memory_space<vmem>>, %arg12: memref<16x32xf32, #tpu.memory_space<vmem>>) attributes {dimension_semantics = [], scalar_prefetch = 0 : i64, scratch_operands = 1 : i64, tpu.core_type = #tpu.core_type<tc>} {
    %c0 = arith.constant 0 : index
    %c0_0 = arith.constant 0 : index
    %0 = vector.load %arg0[%c0, %c0_0] : memref<16x16xf32, #tpu.memory_space<vmem>>, vector<16x16xf32>
    %c0_1 = arith.constant 0 : index
    %c0_2 = arith.constant 0 : index
    %c0_3 = arith.constant 0 : index
    %1 = vector.load %arg1[%c0_1, %c0_2, %c0_3] : memref<3x16x32xf32, #tpu.memory_space<vmem>>, vector<1x16x32xf32>
    %2 = vector.shape_cast %1 : vector<1x16x32xf32> to vector<16x32xf32>
    %c1 = arith.constant 1 : index
    %c0_4 = arith.constant 0 : index
    %c0_5 = arith.constant 0 : index
    %3 = vector.load %arg1[%c1, %c0_4, %c0_5] : memref<3x16x32xf32, #tpu.memory_space<vmem>>, vector<1x16x32xf32>
    %4 = vector.shape_cast %3 : vector<1x16x32xf32> to vector<16x32xf32>
    %c2 = arith.constant 2 : index
    %c0_6 = arith.constant 0 : index
    %c0_7 = arith.constant 0 : index
    %5 = vector.load %arg1[%c2, %c0_6, %c0_7] : memref<3x16x32xf32, #tpu.memory_space<vmem>>, vector<1x16x32xf32>
    %6 = vector.shape_cast %5 : vector<1x16x32xf32> to vector<16x32xf32>
    %c0_8 = arith.constant 0 : index
    %c0_9 = arith.constant 0 : index
    %c0_10 = arith.constant 0 : index
    %7 = vector.load %arg2[%c0_8, %c0_9, %c0_10] : memref<3x32x32xf32, #tpu.memory_space<vmem>>, vector<1x32x32xf32>
    %8 = vector.shape_cast %7 : vector<1x32x32xf32> to vector<32x32xf32>
    %c1_11 = arith.constant 1 : index
    %c0_12 = arith.constant 0 : index
    %c0_13 = arith.constant 0 : index
    %9 = vector.load %arg2[%c1_11, %c0_12, %c0_13] : memref<3x32x32xf32, #tpu.memory_space<vmem>>, vector<1x32x32xf32>
    %10 = vector.shape_cast %9 : vector<1x32x32xf32> to vector<32x32xf32>
    %c2_14 = arith.constant 2 : index
    %c0_15 = arith.constant 0 : index
    %c0_16 = arith.constant 0 : index
    %11 = vector.load %arg2[%c2_14, %c0_15, %c0_16] : memref<3x32x32xf32, #tpu.memory_space<vmem>>, vector<1x32x32xf32>
    %12 = vector.shape_cast %11 : vector<1x32x32xf32> to vector<32x32xf32>
    %c0_17 = arith.constant 0 : index
    %c0_18 = arith.constant 0 : index
    %c0_19 = arith.constant 0 : index
    %13 = vector.load %arg3[%c0_17, %c0_18, %c0_19] : memref<2x1x32xf32, #tpu.memory_space<vmem>>, vector<1x1x32xf32>
    %14 = vector.shape_cast %13 : vector<1x1x32xf32> to vector<1x32xf32>
    %c1_20 = arith.constant 1 : index
    %c0_21 = arith.constant 0 : index
    %c0_22 = arith.constant 0 : index
    %15 = vector.load %arg3[%c1_20, %c0_21, %c0_22] : memref<2x1x32xf32, #tpu.memory_space<vmem>>, vector<1x1x32xf32>
    %16 = vector.shape_cast %15 : vector<1x1x32xf32> to vector<1x32xf32>
    %c0_23 = arith.constant 0 : index
    %c0_24 = arith.constant 0 : index
    %c0_25 = arith.constant 0 : index
    %17 = vector.load %arg4[%c0_23, %c0_24, %c0_25] : memref<2x1x32xf32, #tpu.memory_space<vmem>>, vector<1x1x32xf32>
    %18 = vector.shape_cast %17 : vector<1x1x32xf32> to vector<1x32xf32>
    %c1_26 = arith.constant 1 : index
    %c0_27 = arith.constant 0 : index
    %c0_28 = arith.constant 0 : index
    %19 = vector.load %arg4[%c1_26, %c0_27, %c0_28] : memref<2x1x32xf32, #tpu.memory_space<vmem>>, vector<1x1x32xf32>
    %20 = vector.shape_cast %19 : vector<1x1x32xf32> to vector<1x32xf32>
    %cst = arith.constant dense<0.000000e+00> : vector<16x32xf32>
    %21 = tpu.matmul %0, %2, %cst {dimension_numbers = #tpu.dot_dimension_numbers<[1], [0], [0], [1], [0, 0, 1, 1], [], []>} : vector<16x16xf32>, vector<16x32xf32>, vector<16x32xf32> -> vector<16x32xf32>
    %22 = vector.broadcast %14 : vector<1x32xf32> to vector<16x32xf32>
    %23 = arith.addf %21, %22 : vector<16x32xf32>
    %cst_29 = arith.constant dense<0.000000e+00> : vector<16x32xf32>
    %24 = tpu.matmul %0, %4, %cst_29 {dimension_numbers = #tpu.dot_dimension_numbers<[1], [0], [0], [1], [0, 0, 1, 1], [], []>} : vector<16x16xf32>, vector<16x32xf32>, vector<16x32xf32> -> vector<16x32xf32>
    %25 = vector.broadcast %16 : vector<1x32xf32> to vector<16x32xf32>
    %26 = arith.addf %24, %25 : vector<16x32xf32>
    %cst_30 = arith.constant dense<0.000000e+00> : vector<16x32xf32>
    %27 = tpu.matmul %0, %6, %cst_30 {dimension_numbers = #tpu.dot_dimension_numbers<[1], [0], [0], [1], [0, 0, 1, 1], [], []>} : vector<16x16xf32>, vector<16x32xf32>, vector<16x32xf32> -> vector<16x32xf32>
    %28 = vector.broadcast %18 : vector<1x32xf32> to vector<16x32xf32>
    %29 = arith.addf %27, %28 : vector<16x32xf32>
    %cst_31 = arith.constant 0.000000e+00 : f32
    %30 = vector.broadcast %cst_31 : f32 to vector<2x32xf32>
    %cst_32 = arith.constant dense<0.000000e+00> : vector<2x32xf32>
    %31 = tpu.matmul %30, %8, %cst_32 {dimension_numbers = #tpu.dot_dimension_numbers<[1], [0], [0], [1], [0, 0, 1, 1], [], []>} : vector<2x32xf32>, vector<32x32xf32>, vector<2x32xf32> -> vector<2x32xf32>
    %cst_33 = arith.constant dense<0.000000e+00> : vector<2x32xf32>
    %32 = tpu.matmul %30, %10, %cst_33 {dimension_numbers = #tpu.dot_dimension_numbers<[1], [0], [0], [1], [0, 0, 1, 1], [], []>} : vector<2x32xf32>, vector<32x32xf32>, vector<2x32xf32> -> vector<2x32xf32>
    %cst_34 = arith.constant dense<0.000000e+00> : vector<2x32xf32>
    %33 = tpu.matmul %30, %12, %cst_34 {dimension_numbers = #tpu.dot_dimension_numbers<[1], [0], [0], [1], [0, 0, 1, 1], [], []>} : vector<2x32xf32>, vector<32x32xf32>, vector<2x32xf32> -> vector<2x32xf32>
    %34 = vector.broadcast %20 : vector<1x32xf32> to vector<2x32xf32>
    %35 = arith.addf %33, %34 : vector<2x32xf32>
    %36 = vector.extract_strided_slice %23 {offsets = [0, 0], sizes = [2, 32], strides = [1, 1]} : vector<16x32xf32> to vector<2x32xf32>
    %37 = arith.addf %36, %31 : vector<2x32xf32>
    %38 = arith.negf %37 : vector<2x32xf32>
    %39 = math.exp %38 : vector<2x32xf32>
    %cst_35 = arith.constant 1.000000e+00 : f32
    %40 = vector.broadcast %cst_35 : f32 to vector<2x32xf32>
    %41 = arith.addf %40, %39 : vector<2x32xf32>
    %42 = arith.divf %40, %41 : vector<2x32xf32>
    %43 = vector.extract_strided_slice %26 {offsets = [0, 0], sizes = [2, 32], strides = [1, 1]} : vector<16x32xf32> to vector<2x32xf32>
    %44 = arith.addf %43, %32 : vector<2x32xf32>
    %45 = arith.negf %44 : vector<2x32xf32>
    %46 = math.exp %45 : vector<2x32xf32>
    %cst_36 = arith.constant 1.000000e+00 : f32
    %47 = vector.broadcast %cst_36 : f32 to vector<2x32xf32>
    %48 = arith.addf %47, %46 : vector<2x32xf32>
    %49 = arith.divf %47, %48 : vector<2x32xf32>
    %50 = vector.extract_strided_slice %29 {offsets = [0, 0], sizes = [2, 32], strides = [1, 1]} : vector<16x32xf32> to vector<2x32xf32>
    %51 = arith.mulf %42, %35 : vector<2x32xf32>
    %52 = arith.addf %50, %51 : vector<2x32xf32>
    %53 = math.tanh %52 : vector<2x32xf32>
    %cst_37 = arith.constant 1.000000e+00 : f32
    %54 = vector.broadcast %cst_37 : f32 to vector<2x32xf32>
    %55 = arith.subf %54, %49 : vector<2x32xf32>
    %56 = arith.mulf %55, %53 : vector<2x32xf32>
    %57 = arith.mulf %49, %30 : vector<2x32xf32>
    %58 = arith.addf %56, %57 : vector<2x32xf32>
    %c0_38 = arith.constant 0 : index
    %c0_39 = arith.constant 0 : index
    %59 = vector.load %arg12[%c0_38, %c0_39] : memref<16x32xf32, #tpu.memory_space<vmem>>, vector<2x32xf32>
    tpu.vector_store %arg12[%c0_38, %c0_39], %58 {strides = array<i32>} : memref<16x32xf32, #tpu.memory_space<vmem>>, vector<2x32xf32>,
    %cst_40 = arith.constant dense<0.000000e+00> : vector<2x32xf32>
    %60 = tpu.matmul %58, %8, %cst_40 {dimension_numbers = #tpu.dot_dimension_numbers<[1], [0], [0], [1], [0, 0, 1, 1], [], []>} : vector<2x32xf32>, vector<32x32xf32>, vector<2x32xf32> -> vector<2x32xf32>
    %cst_41 = arith.constant dense<0.000000e+00> : vector<2x32xf32>
    %61 = tpu.matmul %58, %10, %cst_41 {dimension_numbers = #tpu.dot_dimension_numbers<[1], [0], [0], [1], [0, 0, 1, 1], [], []>} : vector<2x32xf32>, vector<32x32xf32>, vector<2x32xf32> -> vector<2x32xf32>
    %cst_42 = arith.constant dense<0.000000e+00> : vector<2x32xf32>
    %62 = tpu.matmul %58, %12, %cst_42 {dimension_numbers = #tpu.dot_dimension_numbers<[1], [0], [0], [1], [0, 0, 1, 1], [], []>} : vector<2x32xf32>, vector<32x32xf32>, vector<2x32xf32> -> vector<2x32xf32>
    %63 = vector.broadcast %20 : vector<1x32xf32> to vector<2x32xf32>
    %64 = arith.addf %62, %63 : vector<2x32xf32>
    %65 = vector.extract_strided_slice %23 {offsets = [2, 0], sizes = [2, 32], strides = [1, 1]} : vector<16x32xf32> to vector<2x32xf32>
    %66 = arith.addf %65, %60 : vector<2x32xf32>
    %67 = arith.negf %66 : vector<2x32xf32>
    %68 = math.exp %67 : vector<2x32xf32>
    %cst_43 = arith.constant 1.000000e+00 : f32
    %69 = vector.broadcast %cst_43 : f32 to vector<2x32xf32>
    %70 = arith.addf %69, %68 : vector<2x32xf32>
    %71 = arith.divf %69, %70 : vector<2x32xf32>
    %72 = vector.extract_strided_slice %26 {offsets = [2, 0], sizes = [2, 32], strides = [1, 1]} : vector<16x32xf32> to vector<2x32xf32>
    %73 = arith.addf %72, %61 : vector<2x32xf32>
    %74 = arith.negf %73 : vector<2x32xf32>
    %75 = math.exp %74 : vector<2x32xf32>
    %cst_44 = arith.constant 1.000000e+00 : f32
    %76 = vector.broadcast %cst_44 : f32 to vector<2x32xf32>
    %77 = arith.addf %76, %75 : vector<2x32xf32>
    %78 = arith.divf %76, %77 : vector<2x32xf32>
    %79 = vector.extract_strided_slice %29 {offsets = [2, 0], sizes = [2, 32], strides = [1, 1]} : vector<16x32xf32> to vector<2x32xf32>
    %80 = arith.mulf %71, %64 : vector<2x32xf32>
    %81 = arith.addf %79, %80 : vector<2x32xf32>
    %82 = math.tanh %81 : vector<2x32xf32>
    %cst_45 = arith.constant 1.000000e+00 : f32
    %83 = vector.broadcast %cst_45 : f32 to vector<2x32xf32>
    %84 = arith.subf %83, %78 : vector<2x32xf32>
    %85 = arith.mulf %84, %82 : vector<2x32xf32>
    %86 = arith.mulf %78, %58 : vector<2x32xf32>
    %87 = arith.addf %85, %86 : vector<2x32xf32>
    %c2_46 = arith.constant 2 : index
    %c0_47 = arith.constant 0 : index
    %88 = vector.load %arg12[%c2_46, %c0_47] : memref<16x32xf32, #tpu.memory_space<vmem>>, vector<2x32xf32>
    tpu.vector_store %arg12[%c2_46, %c0_47], %87 {strides = array<i32>} : memref<16x32xf32, #tpu.memory_space<vmem>>, vector<2x32xf32>,
    %cst_48 = arith.constant dense<0.000000e+00> : vector<2x32xf32>
    %89 = tpu.matmul %87, %8, %cst_48 {dimension_numbers = #tpu.dot_dimension_numbers<[1], [0], [0], [1], [0, 0, 1, 1], [], []>} : vector<2x32xf32>, vector<32x32xf32>, vector<2x32xf32> -> vector<2x32xf32>
    %cst_49 = arith.constant dense<0.000000e+00> : vector<2x32xf32>
    %90 = tpu.matmul %87, %10, %cst_49 {dimension_numbers = #tpu.dot_dimension_numbers<[1], [0], [0], [1], [0, 0, 1, 1], [], []>} : vector<2x32xf32>, vector<32x32xf32>, vector<2x32xf32> -> vector<2x32xf32>
    %cst_50 = arith.constant dense<0.000000e+00> : vector<2x32xf32>
    %91 = tpu.matmul %87, %12, %cst_50 {dimension_numbers = #tpu.dot_dimension_numbers<[1], [0], [0], [1], [0, 0, 1, 1], [], []>} : vector<2x32xf32>, vector<32x32xf32>, vector<2x32xf32> -> vector<2x32xf32>
    %92 = vector.broadcast %20 : vector<1x32xf32> to vector<2x32xf32>
    %93 = arith.addf %91, %92 : vector<2x32xf32>
    %94 = vector.extract_strided_slice %23 {offsets = [4, 0], sizes = [2, 32], strides = [1, 1]} : vector<16x32xf32> to vector<2x32xf32>
    %95 = arith.addf %94, %89 : vector<2x32xf32>
    %96 = arith.negf %95 : vector<2x32xf32>
    %97 = math.exp %96 : vector<2x32xf32>
    %cst_51 = arith.constant 1.000000e+00 : f32
    %98 = vector.broadcast %cst_51 : f32 to vector<2x32xf32>
    %99 = arith.addf %98, %97 : vector<2x32xf32>
    %100 = arith.divf %98, %99 : vector<2x32xf32>
    %101 = vector.extract_strided_slice %26 {offsets = [4, 0], sizes = [2, 32], strides = [1, 1]} : vector<16x32xf32> to vector<2x32xf32>
    %102 = arith.addf %101, %90 : vector<2x32xf32>
    %103 = arith.negf %102 : vector<2x32xf32>
    %104 = math.exp %103 : vector<2x32xf32>
    %cst_52 = arith.constant 1.000000e+00 : f32
    %105 = vector.broadcast %cst_52 : f32 to vector<2x32xf32>
    %106 = arith.addf %105, %104 : vector<2x32xf32>
    %107 = arith.divf %105, %106 : vector<2x32xf32>
    %108 = vector.extract_strided_slice %29 {offsets = [4, 0], sizes = [2, 32], strides = [1, 1]} : vector<16x32xf32> to vector<2x32xf32>
    %109 = arith.mulf %100, %93 : vector<2x32xf32>
    %110 = arith.addf %108, %109 : vector<2x32xf32>
    %111 = math.tanh %110 : vector<2x32xf32>
    %cst_53 = arith.constant 1.000000e+00 : f32
    %112 = vector.broadcast %cst_53 : f32 to vector<2x32xf32>
    %113 = arith.subf %112, %107 : vector<2x32xf32>
    %114 = arith.mulf %113, %111 : vector<2x32xf32>
    %115 = arith.mulf %107, %87 : vector<2x32xf32>
    %116 = arith.addf %114, %115 : vector<2x32xf32>
    %c4 = arith.constant 4 : index
    %c0_54 = arith.constant 0 : index
    %117 = vector.load %arg12[%c4, %c0_54] : memref<16x32xf32, #tpu.memory_space<vmem>>, vector<2x32xf32>
    tpu.vector_store %arg12[%c4, %c0_54], %116 {strides = array<i32>} : memref<16x32xf32, #tpu.memory_space<vmem>>, vector<2x32xf32>,
    %cst_55 = arith.constant dense<0.000000e+00> : vector<2x32xf32>
    %118 = tpu.matmul %116, %8, %cst_55 {dimension_numbers = #tpu.dot_dimension_numbers<[1], [0], [0], [1], [0, 0, 1, 1], [], []>} : vector<2x32xf32>, vector<32x32xf32>, vector<2x32xf32> -> vector<2x32xf32>
    %cst_56 = arith.constant dense<0.000000e+00> : vector<2x32xf32>
    %119 = tpu.matmul %116, %10, %cst_56 {dimension_numbers = #tpu.dot_dimension_numbers<[1], [0], [0], [1], [0, 0, 1, 1], [], []>} : vector<2x32xf32>, vector<32x32xf32>, vector<2x32xf32> -> vector<2x32xf32>
    %cst_57 = arith.constant dense<0.000000e+00> : vector<2x32xf32>
    %120 = tpu.matmul %116, %12, %cst_57 {dimension_numbers = #tpu.dot_dimension_numbers<[1], [0], [0], [1], [0, 0, 1, 1], [], []>} : vector<2x32xf32>, vector<32x32xf32>, vector<2x32xf32> -> vector<2x32xf32>
    %121 = vector.broadcast %20 : vector<1x32xf32> to vector<2x32xf32>
    %122 = arith.addf %120, %121 : vector<2x32xf32>
    %123 = vector.extract_strided_slice %23 {offsets = [6, 0], sizes = [2, 32], strides = [1, 1]} : vector<16x32xf32> to vector<2x32xf32>
    %124 = arith.addf %123, %118 : vector<2x32xf32>
    %125 = arith.negf %124 : vector<2x32xf32>
    %126 = math.exp %125 : vector<2x32xf32>
    %cst_58 = arith.constant 1.000000e+00 : f32
    %127 = vector.broadcast %cst_58 : f32 to vector<2x32xf32>
    %128 = arith.addf %127, %126 : vector<2x32xf32>
    %129 = arith.divf %127, %128 : vector<2x32xf32>
    %130 = vector.extract_strided_slice %26 {offsets = [6, 0], sizes = [2, 32], strides = [1, 1]} : vector<16x32xf32> to vector<2x32xf32>
    %131 = arith.addf %130, %119 : vector<2x32xf32>
    %132 = arith.negf %131 : vector<2x32xf32>
    %133 = math.exp %132 : vector<2x32xf32>
    %cst_59 = arith.constant 1.000000e+00 : f32
    %134 = vector.broadcast %cst_59 : f32 to vector<2x32xf32>
    %135 = arith.addf %134, %133 : vector<2x32xf32>
    %136 = arith.divf %134, %135 : vector<2x32xf32>
    %137 = vector.extract_strided_slice %29 {offsets = [6, 0], sizes = [2, 32], strides = [1, 1]} : vector<16x32xf32> to vector<2x32xf32>
    %138 = arith.mulf %129, %122 : vector<2x32xf32>
    %139 = arith.addf %137, %138 : vector<2x32xf32>
    %140 = math.tanh %139 : vector<2x32xf32>
    %cst_60 = arith.constant 1.000000e+00 : f32
    %141 = vector.broadcast %cst_60 : f32 to vector<2x32xf32>
    %142 = arith.subf %141, %136 : vector<2x32xf32>
    %143 = arith.mulf %142, %140 : vector<2x32xf32>
    %144 = arith.mulf %136, %116 : vector<2x32xf32>
    %145 = arith.addf %143, %144 : vector<2x32xf32>
    %c6 = arith.constant 6 : index
    %c0_61 = arith.constant 0 : index
    %146 = vector.load %arg12[%c6, %c0_61] : memref<16x32xf32, #tpu.memory_space<vmem>>, vector<2x32xf32>
    tpu.vector_store %arg12[%c6, %c0_61], %145 {strides = array<i32>} : memref<16x32xf32, #tpu.memory_space<vmem>>, vector<2x32xf32>,
    %cst_62 = arith.constant dense<0.000000e+00> : vector<2x32xf32>
    %147 = tpu.matmul %145, %8, %cst_62 {dimension_numbers = #tpu.dot_dimension_numbers<[1], [0], [0], [1], [0, 0, 1, 1], [], []>} : vector<2x32xf32>, vector<32x32xf32>, vector<2x32xf32> -> vector<2x32xf32>
    %cst_63 = arith.constant dense<0.000000e+00> : vector<2x32xf32>
    %148 = tpu.matmul %145, %10, %cst_63 {dimension_numbers = #tpu.dot_dimension_numbers<[1], [0], [0], [1], [0, 0, 1, 1], [], []>} : vector<2x32xf32>, vector<32x32xf32>, vector<2x32xf32> -> vector<2x32xf32>
    %cst_64 = arith.constant dense<0.000000e+00> : vector<2x32xf32>
    %149 = tpu.matmul %145, %12, %cst_64 {dimension_numbers = #tpu.dot_dimension_numbers<[1], [0], [0], [1], [0, 0, 1, 1], [], []>} : vector<2x32xf32>, vector<32x32xf32>, vector<2x32xf32> -> vector<2x32xf32>
    %150 = vector.broadcast %20 : vector<1x32xf32> to vector<2x32xf32>
    %151 = arith.addf %149, %150 : vector<2x32xf32>
    %152 = vector.extract_strided_slice %23 {offsets = [8, 0], sizes = [2, 32], strides = [1, 1]} : vector<16x32xf32> to vector<2x32xf32>
    %153 = arith.addf %152, %147 : vector<2x32xf32>
    %154 = arith.negf %153 : vector<2x32xf32>
    %155 = math.exp %154 : vector<2x32xf32>
    %cst_65 = arith.constant 1.000000e+00 : f32
    %156 = vector.broadcast %cst_65 : f32 to vector<2x32xf32>
    %157 = arith.addf %156, %155 : vector<2x32xf32>
    %158 = arith.divf %156, %157 : vector<2x32xf32>
    %159 = vector.extract_strided_slice %26 {offsets = [8, 0], sizes = [2, 32], strides = [1, 1]} : vector<16x32xf32> to vector<2x32xf32>
    %160 = arith.addf %159, %148 : vector<2x32xf32>
    %161 = arith.negf %160 : vector<2x32xf32>
    %162 = math.exp %161 : vector<2x32xf32>
    %cst_66 = arith.constant 1.000000e+00 : f32
    %163 = vector.broadcast %cst_66 : f32 to vector<2x32xf32>
    %164 = arith.addf %163, %162 : vector<2x32xf32>
    %165 = arith.divf %163, %164 : vector<2x32xf32>
    %166 = vector.extract_strided_slice %29 {offsets = [8, 0], sizes = [2, 32], strides = [1, 1]} : vector<16x32xf32> to vector<2x32xf32>
    %167 = arith.mulf %158, %151 : vector<2x32xf32>
    %168 = arith.addf %166, %167 : vector<2x32xf32>
    %169 = math.tanh %168 : vector<2x32xf32>
    %cst_67 = arith.constant 1.000000e+00 : f32
    %170 = vector.broadcast %cst_67 : f32 to vector<2x32xf32>
    %171 = arith.subf %170, %165 : vector<2x32xf32>
    %172 = arith.mulf %171, %169 : vector<2x32xf32>
    %173 = arith.mulf %165, %145 : vector<2x32xf32>
    %174 = arith.addf %172, %173 : vector<2x32xf32>
    %c8 = arith.constant 8 : index
    %c0_68 = arith.constant 0 : index
    %175 = vector.load %arg12[%c8, %c0_68] : memref<16x32xf32, #tpu.memory_space<vmem>>, vector<2x32xf32>
    tpu.vector_store %arg12[%c8, %c0_68], %174 {strides = array<i32>} : memref<16x32xf32, #tpu.memory_space<vmem>>, vector<2x32xf32>,
    %cst_69 = arith.constant dense<0.000000e+00> : vector<2x32xf32>
    %176 = tpu.matmul %174, %8, %cst_69 {dimension_numbers = #tpu.dot_dimension_numbers<[1], [0], [0], [1], [0, 0, 1, 1], [], []>} : vector<2x32xf32>, vector<32x32xf32>, vector<2x32xf32> -> vector<2x32xf32>
    %cst_70 = arith.constant dense<0.000000e+00> : vector<2x32xf32>
    %177 = tpu.matmul %174, %10, %cst_70 {dimension_numbers = #tpu.dot_dimension_numbers<[1], [0], [0], [1], [0, 0, 1, 1], [], []>} : vector<2x32xf32>, vector<32x32xf32>, vector<2x32xf32> -> vector<2x32xf32>
    %cst_71 = arith.constant dense<0.000000e+00> : vector<2x32xf32>
    %178 = tpu.matmul %174, %12, %cst_71 {dimension_numbers = #tpu.dot_dimension_numbers<[1], [0], [0], [1], [0, 0, 1, 1], [], []>} : vector<2x32xf32>, vector<32x32xf32>, vector<2x32xf32> -> vector<2x32xf32>
    %179 = vector.broadcast %20 : vector<1x32xf32> to vector<2x32xf32>
    %180 = arith.addf %178, %179 : vector<2x32xf32>
    %181 = vector.extract_strided_slice %23 {offsets = [10, 0], sizes = [2, 32], strides = [1, 1]} : vector<16x32xf32> to vector<2x32xf32>
    %182 = arith.addf %181, %176 : vector<2x32xf32>
    %183 = arith.negf %182 : vector<2x32xf32>
    %184 = math.exp %183 : vector<2x32xf32>
    %cst_72 = arith.constant 1.000000e+00 : f32
    %185 = vector.broadcast %cst_72 : f32 to vector<2x32xf32>
    %186 = arith.addf %185, %184 : vector<2x32xf32>
    %187 = arith.divf %185, %186 : vector<2x32xf32>
    %188 = vector.extract_strided_slice %26 {offsets = [10, 0], sizes = [2, 32], strides = [1, 1]} : vector<16x32xf32> to vector<2x32xf32>
    %189 = arith.addf %188, %177 : vector<2x32xf32>
    %190 = arith.negf %189 : vector<2x32xf32>
    %191 = math.exp %190 : vector<2x32xf32>
    %cst_73 = arith.constant 1.000000e+00 : f32
    %192 = vector.broadcast %cst_73 : f32 to vector<2x32xf32>
    %193 = arith.addf %192, %191 : vector<2x32xf32>
    %194 = arith.divf %192, %193 : vector<2x32xf32>
    %195 = vector.extract_strided_slice %29 {offsets = [10, 0], sizes = [2, 32], strides = [1, 1]} : vector<16x32xf32> to vector<2x32xf32>
    %196 = arith.mulf %187, %180 : vector<2x32xf32>
    %197 = arith.addf %195, %196 : vector<2x32xf32>
    %198 = math.tanh %197 : vector<2x32xf32>
    %cst_74 = arith.constant 1.000000e+00 : f32
    %199 = vector.broadcast %cst_74 : f32 to vector<2x32xf32>
    %200 = arith.subf %199, %194 : vector<2x32xf32>
    %201 = arith.mulf %200, %198 : vector<2x32xf32>
    %202 = arith.mulf %194, %174 : vector<2x32xf32>
    %203 = arith.addf %201, %202 : vector<2x32xf32>
    %c10 = arith.constant 10 : index
    %c0_75 = arith.constant 0 : index
    %204 = vector.load %arg12[%c10, %c0_75] : memref<16x32xf32, #tpu.memory_space<vmem>>, vector<2x32xf32>
    tpu.vector_store %arg12[%c10, %c0_75], %203 {strides = array<i32>} : memref<16x32xf32, #tpu.memory_space<vmem>>, vector<2x32xf32>,
    %cst_76 = arith.constant dense<0.000000e+00> : vector<2x32xf32>
    %205 = tpu.matmul %203, %8, %cst_76 {dimension_numbers = #tpu.dot_dimension_numbers<[1], [0], [0], [1], [0, 0, 1, 1], [], []>} : vector<2x32xf32>, vector<32x32xf32>, vector<2x32xf32> -> vector<2x32xf32>
    %cst_77 = arith.constant dense<0.000000e+00> : vector<2x32xf32>
    %206 = tpu.matmul %203, %10, %cst_77 {dimension_numbers = #tpu.dot_dimension_numbers<[1], [0], [0], [1], [0, 0, 1, 1], [], []>} : vector<2x32xf32>, vector<32x32xf32>, vector<2x32xf32> -> vector<2x32xf32>
    %cst_78 = arith.constant dense<0.000000e+00> : vector<2x32xf32>
    %207 = tpu.matmul %203, %12, %cst_78 {dimension_numbers = #tpu.dot_dimension_numbers<[1], [0], [0], [1], [0, 0, 1, 1], [], []>} : vector<2x32xf32>, vector<32x32xf32>, vector<2x32xf32> -> vector<2x32xf32>
    %208 = vector.broadcast %20 : vector<1x32xf32> to vector<2x32xf32>
    %209 = arith.addf %207, %208 : vector<2x32xf32>
    %210 = vector.extract_strided_slice %23 {offsets = [12, 0], sizes = [2, 32], strides = [1, 1]} : vector<16x32xf32> to vector<2x32xf32>
    %211 = arith.addf %210, %205 : vector<2x32xf32>
    %212 = arith.negf %211 : vector<2x32xf32>
    %213 = math.exp %212 : vector<2x32xf32>
    %cst_79 = arith.constant 1.000000e+00 : f32
    %214 = vector.broadcast %cst_79 : f32 to vector<2x32xf32>
    %215 = arith.addf %214, %213 : vector<2x32xf32>
    %216 = arith.divf %214, %215 : vector<2x32xf32>
    %217 = vector.extract_strided_slice %26 {offsets = [12, 0], sizes = [2, 32], strides = [1, 1]} : vector<16x32xf32> to vector<2x32xf32>
    %218 = arith.addf %217, %206 : vector<2x32xf32>
    %219 = arith.negf %218 : vector<2x32xf32>
    %220 = math.exp %219 : vector<2x32xf32>
    %cst_80 = arith.constant 1.000000e+00 : f32
    %221 = vector.broadcast %cst_80 : f32 to vector<2x32xf32>
    %222 = arith.addf %221, %220 : vector<2x32xf32>
    %223 = arith.divf %221, %222 : vector<2x32xf32>
    %224 = vector.extract_strided_slice %29 {offsets = [12, 0], sizes = [2, 32], strides = [1, 1]} : vector<16x32xf32> to vector<2x32xf32>
    %225 = arith.mulf %216, %209 : vector<2x32xf32>
    %226 = arith.addf %224, %225 : vector<2x32xf32>
    %227 = math.tanh %226 : vector<2x32xf32>
    %cst_81 = arith.constant 1.000000e+00 : f32
    %228 = vector.broadcast %cst_81 : f32 to vector<2x32xf32>
    %229 = arith.subf %228, %223 : vector<2x32xf32>
    %230 = arith.mulf %229, %227 : vector<2x32xf32>
    %231 = arith.mulf %223, %203 : vector<2x32xf32>
    %232 = arith.addf %230, %231 : vector<2x32xf32>
    %c12 = arith.constant 12 : index
    %c0_82 = arith.constant 0 : index
    %233 = vector.load %arg12[%c12, %c0_82] : memref<16x32xf32, #tpu.memory_space<vmem>>, vector<2x32xf32>
    tpu.vector_store %arg12[%c12, %c0_82], %232 {strides = array<i32>} : memref<16x32xf32, #tpu.memory_space<vmem>>, vector<2x32xf32>,
    %cst_83 = arith.constant dense<0.000000e+00> : vector<2x32xf32>
    %234 = tpu.matmul %232, %8, %cst_83 {dimension_numbers = #tpu.dot_dimension_numbers<[1], [0], [0], [1], [0, 0, 1, 1], [], []>} : vector<2x32xf32>, vector<32x32xf32>, vector<2x32xf32> -> vector<2x32xf32>
    %cst_84 = arith.constant dense<0.000000e+00> : vector<2x32xf32>
    %235 = tpu.matmul %232, %10, %cst_84 {dimension_numbers = #tpu.dot_dimension_numbers<[1], [0], [0], [1], [0, 0, 1, 1], [], []>} : vector<2x32xf32>, vector<32x32xf32>, vector<2x32xf32> -> vector<2x32xf32>
    %cst_85 = arith.constant dense<0.000000e+00> : vector<2x32xf32>
    %236 = tpu.matmul %232, %12, %cst_85 {dimension_numbers = #tpu.dot_dimension_numbers<[1], [0], [0], [1], [0, 0, 1, 1], [], []>} : vector<2x32xf32>, vector<32x32xf32>, vector<2x32xf32> -> vector<2x32xf32>
    %237 = vector.broadcast %20 : vector<1x32xf32> to vector<2x32xf32>
    %238 = arith.addf %236, %237 : vector<2x32xf32>
    %239 = vector.extract_strided_slice %23 {offsets = [14, 0], sizes = [2, 32], strides = [1, 1]} : vector<16x32xf32> to vector<2x32xf32>
    %240 = arith.addf %239, %234 : vector<2x32xf32>
    %241 = arith.negf %240 : vector<2x32xf32>
    %242 = math.exp %241 : vector<2x32xf32>
    %cst_86 = arith.constant 1.000000e+00 : f32
    %243 = vector.broadcast %cst_86 : f32 to vector<2x32xf32>
    %244 = arith.addf %243, %242 : vector<2x32xf32>
    %245 = arith.divf %243, %244 : vector<2x32xf32>
    %246 = vector.extract_strided_slice %26 {offsets = [14, 0], sizes = [2, 32], strides = [1, 1]} : vector<16x32xf32> to vector<2x32xf32>
    %247 = arith.addf %246, %235 : vector<2x32xf32>
    %248 = arith.negf %247 : vector<2x32xf32>
    %249 = math.exp %248 : vector<2x32xf32>
    %cst_87 = arith.constant 1.000000e+00 : f32
    %250 = vector.broadcast %cst_87 : f32 to vector<2x32xf32>
    %251 = arith.addf %250, %249 : vector<2x32xf32>
    %252 = arith.divf %250, %251 : vector<2x32xf32>
    %253 = vector.extract_strided_slice %29 {offsets = [14, 0], sizes = [2, 32], strides = [1, 1]} : vector<16x32xf32> to vector<2x32xf32>
    %254 = arith.mulf %245, %238 : vector<2x32xf32>
    %255 = arith.addf %253, %254 : vector<2x32xf32>
    %256 = math.tanh %255 : vector<2x32xf32>
    %cst_88 = arith.constant 1.000000e+00 : f32
    %257 = vector.broadcast %cst_88 : f32 to vector<2x32xf32>
    %258 = arith.subf %257, %252 : vector<2x32xf32>
    %259 = arith.mulf %258, %256 : vector<2x32xf32>
    %260 = arith.mulf %252, %232 : vector<2x32xf32>
    %261 = arith.addf %259, %260 : vector<2x32xf32>
    %c14 = arith.constant 14 : index
    %c0_89 = arith.constant 0 : index
    %262 = vector.load %arg12[%c14, %c0_89] : memref<16x32xf32, #tpu.memory_space<vmem>>, vector<2x32xf32>
    tpu.vector_store %arg12[%c14, %c0_89], %261 {strides = array<i32>} : memref<16x32xf32, #tpu.memory_space<vmem>>, vector<2x32xf32>,
    %c0_90 = arith.constant 0 : index
    %c0_91 = arith.constant 0 : index
    %263 = vector.load %arg12[%c0_90, %c0_91] : memref<16x32xf32, #tpu.memory_space<vmem>>, vector<16x32xf32>
    %c0_92 = arith.constant 0 : index
    %c0_93 = arith.constant 0 : index
    %c0_94 = arith.constant 0 : index
    %264 = vector.load %arg5[%c0_92, %c0_93, %c0_94] : memref<3x32x32xf32, #tpu.memory_space<vmem>>, vector<1x32x32xf32>
    %265 = vector.shape_cast %264 : vector<1x32x32xf32> to vector<32x32xf32>
    %c1_95 = arith.constant 1 : index
    %c0_96 = arith.constant 0 : index
    %c0_97 = arith.constant 0 : index
    %266 = vector.load %arg5[%c1_95, %c0_96, %c0_97] : memref<3x32x32xf32, #tpu.memory_space<vmem>>, vector<1x32x32xf32>
    %267 = vector.shape_cast %266 : vector<1x32x32xf32> to vector<32x32xf32>
    %c2_98 = arith.constant 2 : index
    %c0_99 = arith.constant 0 : index
    %c0_100 = arith.constant 0 : index
    %268 = vector.load %arg5[%c2_98, %c0_99, %c0_100] : memref<3x32x32xf32, #tpu.memory_space<vmem>>, vector<1x32x32xf32>
    %269 = vector.shape_cast %268 : vector<1x32x32xf32> to vector<32x32xf32>
    %c0_101 = arith.constant 0 : index
    %c0_102 = arith.constant 0 : index
    %c0_103 = arith.constant 0 : index
    %270 = vector.load %arg6[%c0_101, %c0_102, %c0_103] : memref<3x32x32xf32, #tpu.memory_space<vmem>>, vector<1x32x32xf32>
    %271 = vector.shape_cast %270 : vector<1x32x32xf32> to vector<32x32xf32>
    %c1_104 = arith.constant 1 : index
    %c0_105 = arith.constant 0 : index
    %c0_106 = arith.constant 0 : index
    %272 = vector.load %arg6[%c1_104, %c0_105, %c0_106] : memref<3x32x32xf32, #tpu.memory_space<vmem>>, vector<1x32x32xf32>
    %273 = vector.shape_cast %272 : vector<1x32x32xf32> to vector<32x32xf32>
    %c2_107 = arith.constant 2 : index
    %c0_108 = arith.constant 0 : index
    %c0_109 = arith.constant 0 : index
    %274 = vector.load %arg6[%c2_107, %c0_108, %c0_109] : memref<3x32x32xf32, #tpu.memory_space<vmem>>, vector<1x32x32xf32>
    %275 = vector.shape_cast %274 : vector<1x32x32xf32> to vector<32x32xf32>
    %c0_110 = arith.constant 0 : index
    %c0_111 = arith.constant 0 : index
    %c0_112 = arith.constant 0 : index
    %276 = vector.load %arg7[%c0_110, %c0_111, %c0_112] : memref<2x1x32xf32, #tpu.memory_space<vmem>>, vector<1x1x32xf32>
    %277 = vector.shape_cast %276 : vector<1x1x32xf32> to vector<1x32xf32>
    %c1_113 = arith.constant 1 : index
    %c0_114 = arith.constant 0 : index
    %c0_115 = arith.constant 0 : index
    %278 = vector.load %arg7[%c1_113, %c0_114, %c0_115] : memref<2x1x32xf32, #tpu.memory_space<vmem>>, vector<1x1x32xf32>
    %279 = vector.shape_cast %278 : vector<1x1x32xf32> to vector<1x32xf32>
    %c0_116 = arith.constant 0 : index
    %c0_117 = arith.constant 0 : index
    %c0_118 = arith.constant 0 : index
    %280 = vector.load %arg8[%c0_116, %c0_117, %c0_118] : memref<2x1x32xf32, #tpu.memory_space<vmem>>, vector<1x1x32xf32>
    %281 = vector.shape_cast %280 : vector<1x1x32xf32> to vector<1x32xf32>
    %c1_119 = arith.constant 1 : index
    %c0_120 = arith.constant 0 : index
    %c0_121 = arith.constant 0 : index
    %282 = vector.load %arg8[%c1_119, %c0_120, %c0_121] : memref<2x1x32xf32, #tpu.memory_space<vmem>>, vector<1x1x32xf32>
    %283 = vector.shape_cast %282 : vector<1x1x32xf32> to vector<1x32xf32>
    %cst_122 = arith.constant dense<0.000000e+00> : vector<16x32xf32>
    %284 = tpu.matmul %263, %265, %cst_122 {dimension_numbers = #tpu.dot_dimension_numbers<[1], [0], [0], [1], [0, 0, 1, 1], [], []>} : vector<16x32xf32>, vector<32x32xf32>, vector<16x32xf32> -> vector<16x32xf32>
    %285 = vector.broadcast %277 : vector<1x32xf32> to vector<16x32xf32>
    %286 = arith.addf %284, %285 : vector<16x32xf32>
    %cst_123 = arith.constant dense<0.000000e+00> : vector<16x32xf32>
    %287 = tpu.matmul %263, %267, %cst_123 {dimension_numbers = #tpu.dot_dimension_numbers<[1], [0], [0], [1], [0, 0, 1, 1], [], []>} : vector<16x32xf32>, vector<32x32xf32>, vector<16x32xf32> -> vector<16x32xf32>
    %288 = vector.broadcast %279 : vector<1x32xf32> to vector<16x32xf32>
    %289 = arith.addf %287, %288 : vector<16x32xf32>
    %cst_124 = arith.constant dense<0.000000e+00> : vector<16x32xf32>
    %290 = tpu.matmul %263, %269, %cst_124 {dimension_numbers = #tpu.dot_dimension_numbers<[1], [0], [0], [1], [0, 0, 1, 1], [], []>} : vector<16x32xf32>, vector<32x32xf32>, vector<16x32xf32> -> vector<16x32xf32>
    %291 = vector.broadcast %281 : vector<1x32xf32> to vector<16x32xf32>
    %292 = arith.addf %290, %291 : vector<16x32xf32>
    %cst_125 = arith.constant 0.000000e+00 : f32
    %293 = vector.broadcast %cst_125 : f32 to vector<2x32xf32>
    %cst_126 = arith.constant dense<0.000000e+00> : vector<2x32xf32>
    %294 = tpu.matmul %293, %271, %cst_126 {dimension_numbers = #tpu.dot_dimension_numbers<[1], [0], [0], [1], [0, 0, 1, 1], [], []>} : vector<2x32xf32>, vector<32x32xf32>, vector<2x32xf32> -> vector<2x32xf32>
    %cst_127 = arith.constant dense<0.000000e+00> : vector<2x32xf32>
    %295 = tpu.matmul %293, %273, %cst_127 {dimension_numbers = #tpu.dot_dimension_numbers<[1], [0], [0], [1], [0, 0, 1, 1], [], []>} : vector<2x32xf32>, vector<32x32xf32>, vector<2x32xf32> -> vector<2x32xf32>
    %cst_128 = arith.constant dense<0.000000e+00> : vector<2x32xf32>
    %296 = tpu.matmul %293, %275, %cst_128 {dimension_numbers = #tpu.dot_dimension_numbers<[1], [0], [0], [1], [0, 0, 1, 1], [], []>} : vector<2x32xf32>, vector<32x32xf32>, vector<2x32xf32> -> vector<2x32xf32>
    %297 = vector.broadcast %283 : vector<1x32xf32> to vector<2x32xf32>
    %298 = arith.addf %296, %297 : vector<2x32xf32>
    %299 = vector.extract_strided_slice %286 {offsets = [0, 0], sizes = [2, 32], strides = [1, 1]} : vector<16x32xf32> to vector<2x32xf32>
    %300 = arith.addf %299, %294 : vector<2x32xf32>
    %301 = arith.negf %300 : vector<2x32xf32>
    %302 = math.exp %301 : vector<2x32xf32>
    %cst_129 = arith.constant 1.000000e+00 : f32
    %303 = vector.broadcast %cst_129 : f32 to vector<2x32xf32>
    %304 = arith.addf %303, %302 : vector<2x32xf32>
    %305 = arith.divf %303, %304 : vector<2x32xf32>
    %306 = vector.extract_strided_slice %289 {offsets = [0, 0], sizes = [2, 32], strides = [1, 1]} : vector<16x32xf32> to vector<2x32xf32>
    %307 = arith.addf %306, %295 : vector<2x32xf32>
    %308 = arith.negf %307 : vector<2x32xf32>
    %309 = math.exp %308 : vector<2x32xf32>
    %cst_130 = arith.constant 1.000000e+00 : f32
    %310 = vector.broadcast %cst_130 : f32 to vector<2x32xf32>
    %311 = arith.addf %310, %309 : vector<2x32xf32>
    %312 = arith.divf %310, %311 : vector<2x32xf32>
    %313 = vector.extract_strided_slice %292 {offsets = [0, 0], sizes = [2, 32], strides = [1, 1]} : vector<16x32xf32> to vector<2x32xf32>
    %314 = arith.mulf %305, %298 : vector<2x32xf32>
    %315 = arith.addf %313, %314 : vector<2x32xf32>
    %316 = math.tanh %315 : vector<2x32xf32>
    %cst_131 = arith.constant 1.000000e+00 : f32
    %317 = vector.broadcast %cst_131 : f32 to vector<2x32xf32>
    %318 = arith.subf %317, %312 : vector<2x32xf32>
    %319 = arith.mulf %318, %316 : vector<2x32xf32>
    %320 = arith.mulf %312, %293 : vector<2x32xf32>
    %321 = arith.addf %319, %320 : vector<2x32xf32>
    %cst_132 = arith.constant dense<0.000000e+00> : vector<2x32xf32>
    %322 = tpu.matmul %321, %271, %cst_132 {dimension_numbers = #tpu.dot_dimension_numbers<[1], [0], [0], [1], [0, 0, 1, 1], [], []>} : vector<2x32xf32>, vector<32x32xf32>, vector<2x32xf32> -> vector<2x32xf32>
    %cst_133 = arith.constant dense<0.000000e+00> : vector<2x32xf32>
    %323 = tpu.matmul %321, %273, %cst_133 {dimension_numbers = #tpu.dot_dimension_numbers<[1], [0], [0], [1], [0, 0, 1, 1], [], []>} : vector<2x32xf32>, vector<32x32xf32>, vector<2x32xf32> -> vector<2x32xf32>
    %cst_134 = arith.constant dense<0.000000e+00> : vector<2x32xf32>
    %324 = tpu.matmul %321, %275, %cst_134 {dimension_numbers = #tpu.dot_dimension_numbers<[1], [0], [0], [1], [0, 0, 1, 1], [], []>} : vector<2x32xf32>, vector<32x32xf32>, vector<2x32xf32> -> vector<2x32xf32>
    %325 = vector.broadcast %283 : vector<1x32xf32> to vector<2x32xf32>
    %326 = arith.addf %324, %325 : vector<2x32xf32>
    %327 = vector.extract_strided_slice %286 {offsets = [2, 0], sizes = [2, 32], strides = [1, 1]} : vector<16x32xf32> to vector<2x32xf32>
    %328 = arith.addf %327, %322 : vector<2x32xf32>
    %329 = arith.negf %328 : vector<2x32xf32>
    %330 = math.exp %329 : vector<2x32xf32>
    %cst_135 = arith.constant 1.000000e+00 : f32
    %331 = vector.broadcast %cst_135 : f32 to vector<2x32xf32>
    %332 = arith.addf %331, %330 : vector<2x32xf32>
    %333 = arith.divf %331, %332 : vector<2x32xf32>
    %334 = vector.extract_strided_slice %289 {offsets = [2, 0], sizes = [2, 32], strides = [1, 1]} : vector<16x32xf32> to vector<2x32xf32>
    %335 = arith.addf %334, %323 : vector<2x32xf32>
    %336 = arith.negf %335 : vector<2x32xf32>
    %337 = math.exp %336 : vector<2x32xf32>
    %cst_136 = arith.constant 1.000000e+00 : f32
    %338 = vector.broadcast %cst_136 : f32 to vector<2x32xf32>
    %339 = arith.addf %338, %337 : vector<2x32xf32>
    %340 = arith.divf %338, %339 : vector<2x32xf32>
    %341 = vector.extract_strided_slice %292 {offsets = [2, 0], sizes = [2, 32], strides = [1, 1]} : vector<16x32xf32> to vector<2x32xf32>
    %342 = arith.mulf %333, %326 : vector<2x32xf32>
    %343 = arith.addf %341, %342 : vector<2x32xf32>
    %344 = math.tanh %343 : vector<2x32xf32>
    %cst_137 = arith.constant 1.000000e+00 : f32
    %345 = vector.broadcast %cst_137 : f32 to vector<2x32xf32>
    %346 = arith.subf %345, %340 : vector<2x32xf32>
    %347 = arith.mulf %346, %344 : vector<2x32xf32>
    %348 = arith.mulf %340, %321 : vector<2x32xf32>
    %349 = arith.addf %347, %348 : vector<2x32xf32>
    %cst_138 = arith.constant dense<0.000000e+00> : vector<2x32xf32>
    %350 = tpu.matmul %349, %271, %cst_138 {dimension_numbers = #tpu.dot_dimension_numbers<[1], [0], [0], [1], [0, 0, 1, 1], [], []>} : vector<2x32xf32>, vector<32x32xf32>, vector<2x32xf32> -> vector<2x32xf32>
    %cst_139 = arith.constant dense<0.000000e+00> : vector<2x32xf32>
    %351 = tpu.matmul %349, %273, %cst_139 {dimension_numbers = #tpu.dot_dimension_numbers<[1], [0], [0], [1], [0, 0, 1, 1], [], []>} : vector<2x32xf32>, vector<32x32xf32>, vector<2x32xf32> -> vector<2x32xf32>
    %cst_140 = arith.constant dense<0.000000e+00> : vector<2x32xf32>
    %352 = tpu.matmul %349, %275, %cst_140 {dimension_numbers = #tpu.dot_dimension_numbers<[1], [0], [0], [1], [0, 0, 1, 1], [], []>} : vector<2x32xf32>, vector<32x32xf32>, vector<2x32xf32> -> vector<2x32xf32>
    %353 = vector.broadcast %283 : vector<1x32xf32> to vector<2x32xf32>
    %354 = arith.addf %352, %353 : vector<2x32xf32>
    %355 = vector.extract_strided_slice %286 {offsets = [4, 0], sizes = [2, 32], strides = [1, 1]} : vector<16x32xf32> to vector<2x32xf32>
    %356 = arith.addf %355, %350 : vector<2x32xf32>
    %357 = arith.negf %356 : vector<2x32xf32>
    %358 = math.exp %357 : vector<2x32xf32>
    %cst_141 = arith.constant 1.000000e+00 : f32
    %359 = vector.broadcast %cst_141 : f32 to vector<2x32xf32>
    %360 = arith.addf %359, %358 : vector<2x32xf32>
    %361 = arith.divf %359, %360 : vector<2x32xf32>
    %362 = vector.extract_strided_slice %289 {offsets = [4, 0], sizes = [2, 32], strides = [1, 1]} : vector<16x32xf32> to vector<2x32xf32>
    %363 = arith.addf %362, %351 : vector<2x32xf32>
    %364 = arith.negf %363 : vector<2x32xf32>
    %365 = math.exp %364 : vector<2x32xf32>
    %cst_142 = arith.constant 1.000000e+00 : f32
    %366 = vector.broadcast %cst_142 : f32 to vector<2x32xf32>
    %367 = arith.addf %366, %365 : vector<2x32xf32>
    %368 = arith.divf %366, %367 : vector<2x32xf32>
    %369 = vector.extract_strided_slice %292 {offsets = [4, 0], sizes = [2, 32], strides = [1, 1]} : vector<16x32xf32> to vector<2x32xf32>
    %370 = arith.mulf %361, %354 : vector<2x32xf32>
    %371 = arith.addf %369, %370 : vector<2x32xf32>
    %372 = math.tanh %371 : vector<2x32xf32>
    %cst_143 = arith.constant 1.000000e+00 : f32
    %373 = vector.broadcast %cst_143 : f32 to vector<2x32xf32>
    %374 = arith.subf %373, %368 : vector<2x32xf32>
    %375 = arith.mulf %374, %372 : vector<2x32xf32>
    %376 = arith.mulf %368, %349 : vector<2x32xf32>
    %377 = arith.addf %375, %376 : vector<2x32xf32>
    %cst_144 = arith.constant dense<0.000000e+00> : vector<2x32xf32>
    %378 = tpu.matmul %377, %271, %cst_144 {dimension_numbers = #tpu.dot_dimension_numbers<[1], [0], [0], [1], [0, 0, 1, 1], [], []>} : vector<2x32xf32>, vector<32x32xf32>, vector<2x32xf32> -> vector<2x32xf32>
    %cst_145 = arith.constant dense<0.000000e+00> : vector<2x32xf32>
    %379 = tpu.matmul %377, %273, %cst_145 {dimension_numbers = #tpu.dot_dimension_numbers<[1], [0], [0], [1], [0, 0, 1, 1], [], []>} : vector<2x32xf32>, vector<32x32xf32>, vector<2x32xf32> -> vector<2x32xf32>
    %cst_146 = arith.constant dense<0.000000e+00> : vector<2x32xf32>
    %380 = tpu.matmul %377, %275, %cst_146 {dimension_numbers = #tpu.dot_dimension_numbers<[1], [0], [0], [1], [0, 0, 1, 1], [], []>} : vector<2x32xf32>, vector<32x32xf32>, vector<2x32xf32> -> vector<2x32xf32>
    %381 = vector.broadcast %283 : vector<1x32xf32> to vector<2x32xf32>
    %382 = arith.addf %380, %381 : vector<2x32xf32>
    %383 = vector.extract_strided_slice %286 {offsets = [6, 0], sizes = [2, 32], strides = [1, 1]} : vector<16x32xf32> to vector<2x32xf32>
    %384 = arith.addf %383, %378 : vector<2x32xf32>
    %385 = arith.negf %384 : vector<2x32xf32>
    %386 = math.exp %385 : vector<2x32xf32>
    %cst_147 = arith.constant 1.000000e+00 : f32
    %387 = vector.broadcast %cst_147 : f32 to vector<2x32xf32>
    %388 = arith.addf %387, %386 : vector<2x32xf32>
    %389 = arith.divf %387, %388 : vector<2x32xf32>
    %390 = vector.extract_strided_slice %289 {offsets = [6, 0], sizes = [2, 32], strides = [1, 1]} : vector<16x32xf32> to vector<2x32xf32>
    %391 = arith.addf %390, %379 : vector<2x32xf32>
    %392 = arith.negf %391 : vector<2x32xf32>
    %393 = math.exp %392 : vector<2x32xf32>
    %cst_148 = arith.constant 1.000000e+00 : f32
    %394 = vector.broadcast %cst_148 : f32 to vector<2x32xf32>
    %395 = arith.addf %394, %393 : vector<2x32xf32>
    %396 = arith.divf %394, %395 : vector<2x32xf32>
    %397 = vector.extract_strided_slice %292 {offsets = [6, 0], sizes = [2, 32], strides = [1, 1]} : vector<16x32xf32> to vector<2x32xf32>
    %398 = arith.mulf %389, %382 : vector<2x32xf32>
    %399 = arith.addf %397, %398 : vector<2x32xf32>
    %400 = math.tanh %399 : vector<2x32xf32>
    %cst_149 = arith.constant 1.000000e+00 : f32
    %401 = vector.broadcast %cst_149 : f32 to vector<2x32xf32>
    %402 = arith.subf %401, %396 : vector<2x32xf32>
    %403 = arith.mulf %402, %400 : vector<2x32xf32>
    %404 = arith.mulf %396, %377 : vector<2x32xf32>
    %405 = arith.addf %403, %404 : vector<2x32xf32>
    %cst_150 = arith.constant dense<0.000000e+00> : vector<2x32xf32>
    %406 = tpu.matmul %405, %271, %cst_150 {dimension_numbers = #tpu.dot_dimension_numbers<[1], [0], [0], [1], [0, 0, 1, 1], [], []>} : vector<2x32xf32>, vector<32x32xf32>, vector<2x32xf32> -> vector<2x32xf32>
    %cst_151 = arith.constant dense<0.000000e+00> : vector<2x32xf32>
    %407 = tpu.matmul %405, %273, %cst_151 {dimension_numbers = #tpu.dot_dimension_numbers<[1], [0], [0], [1], [0, 0, 1, 1], [], []>} : vector<2x32xf32>, vector<32x32xf32>, vector<2x32xf32> -> vector<2x32xf32>
    %cst_152 = arith.constant dense<0.000000e+00> : vector<2x32xf32>
    %408 = tpu.matmul %405, %275, %cst_152 {dimension_numbers = #tpu.dot_dimension_numbers<[1], [0], [0], [1], [0, 0, 1, 1], [], []>} : vector<2x32xf32>, vector<32x32xf32>, vector<2x32xf32> -> vector<2x32xf32>
    %409 = vector.broadcast %283 : vector<1x32xf32> to vector<2x32xf32>
    %410 = arith.addf %408, %409 : vector<2x32xf32>
    %411 = vector.extract_strided_slice %286 {offsets = [8, 0], sizes = [2, 32], strides = [1, 1]} : vector<16x32xf32> to vector<2x32xf32>
    %412 = arith.addf %411, %406 : vector<2x32xf32>
    %413 = arith.negf %412 : vector<2x32xf32>
    %414 = math.exp %413 : vector<2x32xf32>
    %cst_153 = arith.constant 1.000000e+00 : f32
    %415 = vector.broadcast %cst_153 : f32 to vector<2x32xf32>
    %416 = arith.addf %415, %414 : vector<2x32xf32>
    %417 = arith.divf %415, %416 : vector<2x32xf32>
    %418 = vector.extract_strided_slice %289 {offsets = [8, 0], sizes = [2, 32], strides = [1, 1]} : vector<16x32xf32> to vector<2x32xf32>
    %419 = arith.addf %418, %407 : vector<2x32xf32>
    %420 = arith.negf %419 : vector<2x32xf32>
    %421 = math.exp %420 : vector<2x32xf32>
    %cst_154 = arith.constant 1.000000e+00 : f32
    %422 = vector.broadcast %cst_154 : f32 to vector<2x32xf32>
    %423 = arith.addf %422, %421 : vector<2x32xf32>
    %424 = arith.divf %422, %423 : vector<2x32xf32>
    %425 = vector.extract_strided_slice %292 {offsets = [8, 0], sizes = [2, 32], strides = [1, 1]} : vector<16x32xf32> to vector<2x32xf32>
    %426 = arith.mulf %417, %410 : vector<2x32xf32>
    %427 = arith.addf %425, %426 : vector<2x32xf32>
    %428 = math.tanh %427 : vector<2x32xf32>
    %cst_155 = arith.constant 1.000000e+00 : f32
    %429 = vector.broadcast %cst_155 : f32 to vector<2x32xf32>
    %430 = arith.subf %429, %424 : vector<2x32xf32>
    %431 = arith.mulf %430, %428 : vector<2x32xf32>
    %432 = arith.mulf %424, %405 : vector<2x32xf32>
    %433 = arith.addf %431, %432 : vector<2x32xf32>
    %cst_156 = arith.constant dense<0.000000e+00> : vector<2x32xf32>
    %434 = tpu.matmul %433, %271, %cst_156 {dimension_numbers = #tpu.dot_dimension_numbers<[1], [0], [0], [1], [0, 0, 1, 1], [], []>} : vector<2x32xf32>, vector<32x32xf32>, vector<2x32xf32> -> vector<2x32xf32>
    %cst_157 = arith.constant dense<0.000000e+00> : vector<2x32xf32>
    %435 = tpu.matmul %433, %273, %cst_157 {dimension_numbers = #tpu.dot_dimension_numbers<[1], [0], [0], [1], [0, 0, 1, 1], [], []>} : vector<2x32xf32>, vector<32x32xf32>, vector<2x32xf32> -> vector<2x32xf32>
    %cst_158 = arith.constant dense<0.000000e+00> : vector<2x32xf32>
    %436 = tpu.matmul %433, %275, %cst_158 {dimension_numbers = #tpu.dot_dimension_numbers<[1], [0], [0], [1], [0, 0, 1, 1], [], []>} : vector<2x32xf32>, vector<32x32xf32>, vector<2x32xf32> -> vector<2x32xf32>
    %437 = vector.broadcast %283 : vector<1x32xf32> to vector<2x32xf32>
    %438 = arith.addf %436, %437 : vector<2x32xf32>
    %439 = vector.extract_strided_slice %286 {offsets = [10, 0], sizes = [2, 32], strides = [1, 1]} : vector<16x32xf32> to vector<2x32xf32>
    %440 = arith.addf %439, %434 : vector<2x32xf32>
    %441 = arith.negf %440 : vector<2x32xf32>
    %442 = math.exp %441 : vector<2x32xf32>
    %cst_159 = arith.constant 1.000000e+00 : f32
    %443 = vector.broadcast %cst_159 : f32 to vector<2x32xf32>
    %444 = arith.addf %443, %442 : vector<2x32xf32>
    %445 = arith.divf %443, %444 : vector<2x32xf32>
    %446 = vector.extract_strided_slice %289 {offsets = [10, 0], sizes = [2, 32], strides = [1, 1]} : vector<16x32xf32> to vector<2x32xf32>
    %447 = arith.addf %446, %435 : vector<2x32xf32>
    %448 = arith.negf %447 : vector<2x32xf32>
    %449 = math.exp %448 : vector<2x32xf32>
    %cst_160 = arith.constant 1.000000e+00 : f32
    %450 = vector.broadcast %cst_160 : f32 to vector<2x32xf32>
    %451 = arith.addf %450, %449 : vector<2x32xf32>
    %452 = arith.divf %450, %451 : vector<2x32xf32>
    %453 = vector.extract_strided_slice %292 {offsets = [10, 0], sizes = [2, 32], strides = [1, 1]} : vector<16x32xf32> to vector<2x32xf32>
    %454 = arith.mulf %445, %438 : vector<2x32xf32>
    %455 = arith.addf %453, %454 : vector<2x32xf32>
    %456 = math.tanh %455 : vector<2x32xf32>
    %cst_161 = arith.constant 1.000000e+00 : f32
    %457 = vector.broadcast %cst_161 : f32 to vector<2x32xf32>
    %458 = arith.subf %457, %452 : vector<2x32xf32>
    %459 = arith.mulf %458, %456 : vector<2x32xf32>
    %460 = arith.mulf %452, %433 : vector<2x32xf32>
    %461 = arith.addf %459, %460 : vector<2x32xf32>
    %cst_162 = arith.constant dense<0.000000e+00> : vector<2x32xf32>
    %462 = tpu.matmul %461, %271, %cst_162 {dimension_numbers = #tpu.dot_dimension_numbers<[1], [0], [0], [1], [0, 0, 1, 1], [], []>} : vector<2x32xf32>, vector<32x32xf32>, vector<2x32xf32> -> vector<2x32xf32>
    %cst_163 = arith.constant dense<0.000000e+00> : vector<2x32xf32>
    %463 = tpu.matmul %461, %273, %cst_163 {dimension_numbers = #tpu.dot_dimension_numbers<[1], [0], [0], [1], [0, 0, 1, 1], [], []>} : vector<2x32xf32>, vector<32x32xf32>, vector<2x32xf32> -> vector<2x32xf32>
    %cst_164 = arith.constant dense<0.000000e+00> : vector<2x32xf32>
    %464 = tpu.matmul %461, %275, %cst_164 {dimension_numbers = #tpu.dot_dimension_numbers<[1], [0], [0], [1], [0, 0, 1, 1], [], []>} : vector<2x32xf32>, vector<32x32xf32>, vector<2x32xf32> -> vector<2x32xf32>
    %465 = vector.broadcast %283 : vector<1x32xf32> to vector<2x32xf32>
    %466 = arith.addf %464, %465 : vector<2x32xf32>
    %467 = vector.extract_strided_slice %286 {offsets = [12, 0], sizes = [2, 32], strides = [1, 1]} : vector<16x32xf32> to vector<2x32xf32>
    %468 = arith.addf %467, %462 : vector<2x32xf32>
    %469 = arith.negf %468 : vector<2x32xf32>
    %470 = math.exp %469 : vector<2x32xf32>
    %cst_165 = arith.constant 1.000000e+00 : f32
    %471 = vector.broadcast %cst_165 : f32 to vector<2x32xf32>
    %472 = arith.addf %471, %470 : vector<2x32xf32>
    %473 = arith.divf %471, %472 : vector<2x32xf32>
    %474 = vector.extract_strided_slice %289 {offsets = [12, 0], sizes = [2, 32], strides = [1, 1]} : vector<16x32xf32> to vector<2x32xf32>
    %475 = arith.addf %474, %463 : vector<2x32xf32>
    %476 = arith.negf %475 : vector<2x32xf32>
    %477 = math.exp %476 : vector<2x32xf32>
    %cst_166 = arith.constant 1.000000e+00 : f32
    %478 = vector.broadcast %cst_166 : f32 to vector<2x32xf32>
    %479 = arith.addf %478, %477 : vector<2x32xf32>
    %480 = arith.divf %478, %479 : vector<2x32xf32>
    %481 = vector.extract_strided_slice %292 {offsets = [12, 0], sizes = [2, 32], strides = [1, 1]} : vector<16x32xf32> to vector<2x32xf32>
    %482 = arith.mulf %473, %466 : vector<2x32xf32>
    %483 = arith.addf %481, %482 : vector<2x32xf32>
    %484 = math.tanh %483 : vector<2x32xf32>
    %cst_167 = arith.constant 1.000000e+00 : f32
    %485 = vector.broadcast %cst_167 : f32 to vector<2x32xf32>
    %486 = arith.subf %485, %480 : vector<2x32xf32>
    %487 = arith.mulf %486, %484 : vector<2x32xf32>
    %488 = arith.mulf %480, %461 : vector<2x32xf32>
    %489 = arith.addf %487, %488 : vector<2x32xf32>
    %cst_168 = arith.constant dense<0.000000e+00> : vector<2x32xf32>
    %490 = tpu.matmul %489, %271, %cst_168 {dimension_numbers = #tpu.dot_dimension_numbers<[1], [0], [0], [1], [0, 0, 1, 1], [], []>} : vector<2x32xf32>, vector<32x32xf32>, vector<2x32xf32> -> vector<2x32xf32>
    %cst_169 = arith.constant dense<0.000000e+00> : vector<2x32xf32>
    %491 = tpu.matmul %489, %273, %cst_169 {dimension_numbers = #tpu.dot_dimension_numbers<[1], [0], [0], [1], [0, 0, 1, 1], [], []>} : vector<2x32xf32>, vector<32x32xf32>, vector<2x32xf32> -> vector<2x32xf32>
    %cst_170 = arith.constant dense<0.000000e+00> : vector<2x32xf32>
    %492 = tpu.matmul %489, %275, %cst_170 {dimension_numbers = #tpu.dot_dimension_numbers<[1], [0], [0], [1], [0, 0, 1, 1], [], []>} : vector<2x32xf32>, vector<32x32xf32>, vector<2x32xf32> -> vector<2x32xf32>
    %493 = vector.broadcast %283 : vector<1x32xf32> to vector<2x32xf32>
    %494 = arith.addf %492, %493 : vector<2x32xf32>
    %495 = vector.extract_strided_slice %286 {offsets = [14, 0], sizes = [2, 32], strides = [1, 1]} : vector<16x32xf32> to vector<2x32xf32>
    %496 = arith.addf %495, %490 : vector<2x32xf32>
    %497 = arith.negf %496 : vector<2x32xf32>
    %498 = math.exp %497 : vector<2x32xf32>
    %cst_171 = arith.constant 1.000000e+00 : f32
    %499 = vector.broadcast %cst_171 : f32 to vector<2x32xf32>
    %500 = arith.addf %499, %498 : vector<2x32xf32>
    %501 = arith.divf %499, %500 : vector<2x32xf32>
    %502 = vector.extract_strided_slice %289 {offsets = [14, 0], sizes = [2, 32], strides = [1, 1]} : vector<16x32xf32> to vector<2x32xf32>
    %503 = arith.addf %502, %491 : vector<2x32xf32>
    %504 = arith.negf %503 : vector<2x32xf32>
    %505 = math.exp %504 : vector<2x32xf32>
    %cst_172 = arith.constant 1.000000e+00 : f32
    %506 = vector.broadcast %cst_172 : f32 to vector<2x32xf32>
    %507 = arith.addf %506, %505 : vector<2x32xf32>
    %508 = arith.divf %506, %507 : vector<2x32xf32>
    %509 = vector.extract_strided_slice %292 {offsets = [14, 0], sizes = [2, 32], strides = [1, 1]} : vector<16x32xf32> to vector<2x32xf32>
    %510 = arith.mulf %501, %494 : vector<2x32xf32>
    %511 = arith.addf %509, %510 : vector<2x32xf32>
    %512 = math.tanh %511 : vector<2x32xf32>
    %cst_173 = arith.constant 1.000000e+00 : f32
    %513 = vector.broadcast %cst_173 : f32 to vector<2x32xf32>
    %514 = arith.subf %513, %508 : vector<2x32xf32>
    %515 = arith.mulf %514, %512 : vector<2x32xf32>
    %516 = arith.mulf %508, %489 : vector<2x32xf32>
    %517 = arith.addf %515, %516 : vector<2x32xf32>
    %c0_174 = arith.constant 0 : index
    %c0_175 = arith.constant 0 : index
    %518 = vector.load %arg9[%c0_174, %c0_175] : memref<32x10xf32, #tpu.memory_space<vmem>>, vector<32x10xf32>
    %cst_176 = arith.constant dense<0.000000e+00> : vector<2x10xf32>
    %519 = tpu.matmul %517, %518, %cst_176 {dimension_numbers = #tpu.dot_dimension_numbers<[1], [0], [0], [1], [0, 0, 1, 1], [], []>} : vector<2x32xf32>, vector<32x10xf32>, vector<2x10xf32> -> vector<2x10xf32>
    %c0_177 = arith.constant 0 : index
    %c0_178 = arith.constant 0 : index
    %520 = vector.load %arg10[%c0_177, %c0_178] : memref<1x10xf32, #tpu.memory_space<vmem>>, vector<1x10xf32>
    %521 = vector.broadcast %520 : vector<1x10xf32> to vector<2x10xf32>
    %522 = arith.addf %519, %521 : vector<2x10xf32>
    %c0_179 = arith.constant 0 : index
    %c0_180 = arith.constant 0 : index
    %523 = vector.load %arg11[%c0_179, %c0_180] : memref<2x10xf32, #tpu.memory_space<vmem>>, vector<2x10xf32>
    tpu.vector_store %arg11[%c0_179, %c0_180], %522 {strides = array<i32>} : memref<2x10xf32, #tpu.memory_space<vmem>>, vector<2x10xf32>,
    return
  }
}

</mosaic_0001>

<bundles_post_ra>
// kernel: tpu_custom_call.1
= control target key start
LH: loop header
LB: loop body
LE: loop exit
PB: predicated region body
PF: predicated region fallthrough
CT: control target
= control target key end

     0   :  { %16 = vsyncpa [#allocation4], 0  ;;  %s6963_s0 = inlined_call_operand.hbm [shape: f32[16,16], index: 0, kind: input, shape index: {}]   ;;  %s6964_s1 = inlined_call_operand.vmem [shape: f32[3,16,32], index: 1, kind: input, shape index: {}]   ;;  %s6965_s2 = inlined_call_operand.hbm [shape: f32[3,32,32], index: 2, kind: input, shape index: {}]   ;;  %s6966_s3 = inlined_call_operand.vmem [shape: f32[2,1,32], index: 3, kind: input, shape index: {}]   ;;  %s6967_s4 = inlined_call_operand.vmem [shape: f32[2,1,32], index: 4, kind: input, shape index: {}]   ;;  %s6968_s5 = inlined_call_operand.hbm [shape: f32[3,32,32], index: 5, kind: input, shape index: {}]   ;;  %s6969_s6 = inlined_call_operand.hbm [shape: f32[3,32,32], index: 6, kind: input, shape index: {}]   ;;  %s6970_s7 = inlined_call_operand.vmem [shape: f32[2,1,32], index: 7, kind: input, shape index: {}]   ;;  %s6971_s8 = inlined_call_operand.vmem [shape: f32[2,1,32], index: 8, kind: input, shape index: {}]   ;;  %s6972_s9 = inlined_call_operand.vmem [shape: f32[32,10], index: 9, kind: input, shape index: {}]   ;;  %s6973_s10 = inlined_call_operand.vmem [shape: f32[1,10], index: 10, kind: input, shape index: {}]   ;;  %s6974_s11 = inlined_call_operand.hbm [shape: f32[2,10], index: 11, kind: output, shape index: {}]  }
   0x1   :  { %17 = vsyncpa [#allocation7], 0 }
   0x2   :  { %18 = vsyncpa [#allocation10], 0 }
   0x3   :  { %19 = vsyncpa [#allocation5], 0  ;;  %s6263_s17 = smov [#allocation6]   ;;  %s6264_s19 = smov [#allocation3]  }
   0x4   :  { %s39_s18 = sshll.u32 %s6263_s17, 4  ;;  %s25_s20 = sshll.u32 %s6264_s19, 4  ;;  %s40_s18 = int_to_ptr.vmem [resolvable:$true] %s39_s18  ;;  %s6333_s20 = int_to_ptr.vmem [resolvable:$true] %s25_s20 }
   0x5   :  { %s6145_s23 = scalar_lea.hbm %s6965_s2, 1536 }
   0x6   :  { %p6146_p0 = scmp.ne.s32.totalorder %s6965_s2, %s6145_s23  ;;  %p6149_p1 = scmp.lt.u32.totalorder %s6145_s23, %s6965_s2 }
   0x8   :  { %p6151_p2 = pnand %p6149_p1, %p6146_p0 }
   0xa   :  { %6154 = shalt.err (!%p6151_p2)
}
   0xb   :  { %s6155_s28 = scalar_lea.vmem %s40_s18, 1536  ;;  %p6160_p4 = scmp.lt.s32.totalorder %s40_s18, %s40_s18 }
   0xc   :  { %p6156_p3 = scmp.ne.s32.totalorder %s40_s18, %s6155_s28  ;;  %p6161_p5 = scmp.lt.s32.totalorder %s6155_s28, %s6155_s28 }
   0xe   :  { %p6162_p6 = por %p6161_p5, %p6160_p4 }
  0x10   :  { %p6163_p7 = pnand %p6162_p6, %p6156_p3 }
  0x12   :  { %6166 = shalt.err (!%p6163_p7)
}
  0x13   :  { %s6265_s29 = smov 128   ;;  %s6266_s30 = smov 8  }
  0x14   :  { %45 = dma.hbm_to_vmem [thread:$0]  %s6965_s2, 1536, %s40_s18, [#allocation7], %s6265_s29, %s6265_s29, %s6266_s30  }
  0x15   :  { %s6167_s16 = scalar_lea.hbm %s6963_s0, 256 }
  0x16   :  { %p6168_p8 = scmp.ne.s32.totalorder %s6963_s0, %s6167_s16  ;;  %p6171_p9 = scmp.lt.u32.totalorder %s6167_s16, %s6963_s0 }
  0x18   :  { %p6173_p10 = pnand %p6171_p9, %p6168_p8 }
  0x1a   :  { %6176 = shalt.err (!%p6173_p10)
}
  0x1b   :  { %s6177_s23 = scalar_lea.vmem %s6333_s20, 256  ;;  %p6182_p12 = scmp.lt.s32.totalorder %s6333_s20, %s6333_s20 }
  0x1c   :  { %p6178_p11 = scmp.ne.s32.totalorder %s6333_s20, %s6177_s23  ;;  %p6183_p13 = scmp.lt.s32.totalorder %s6177_s23, %s6177_s23 }
  0x1e   :  { %p6184_p0 = por %p6183_p13, %p6182_p12 }
  0x20   :  { %p6185_p1 = pnand %p6184_p0, %p6178_p11 }
  0x22   :  { %6188 = shalt.err (!%p6185_p1)
}
  0x23   :  { %31 = dma.hbm_to_vmem [thread:$0]  %s6963_s0, 256, %s6333_s20, [#allocation4], %s6265_s29, %s6265_s29, %s6266_s30  }
  0x24   :  { %s6267_s24 = smov [#allocation8]   ;;  %s6268_s26 = smov [#allocation9]  }
  0x25   :  { %s55_s25 = sshll.u32 %s6267_s24, 4  ;;  %s67_s27 = sshll.u32 %s6268_s26, 4  ;;  %s56_s25 = int_to_ptr.vmem [resolvable:$true] %s55_s25  ;;  %s6370_s27 = int_to_ptr.vmem [resolvable:$true] %s67_s27 }
  0x26   :  { %s6189_s13 = scalar_lea.hbm %s6968_s5, 1536 }
  0x27   :  { %p6190_p2 = scmp.ne.s32.totalorder %s6968_s5, %s6189_s13  ;;  %p6193_p3 = scmp.lt.u32.totalorder %s6189_s13, %s6968_s5 }
  0x29   :  { %p6195_p4 = pnand %p6193_p3, %p6190_p2 }
  0x2b   :  { %6198 = shalt.err (!%p6195_p4)
}
  0x2c   :  { %s6199_s0 = scalar_lea.vmem %s56_s25, 1536  ;;  %p6204_p6 = scmp.lt.s32.totalorder %s56_s25, %s56_s25 }
  0x2d   :  { %p6200_p5 = scmp.ne.s32.totalorder %s56_s25, %s6199_s0  ;;  %p6205_p7 = scmp.lt.s32.totalorder %s6199_s0, %s6199_s0 }
  0x2f   :  { %p6206_p8 = por %p6205_p7, %p6204_p6 }
  0x31   :  { %p6207_p9 = pnand %p6206_p8, %p6200_p5 }
  0x33   :  { %6210 = shalt.err (!%p6207_p9)
}
  0x34   :  { %61 = dma.hbm_to_vmem [thread:$0]  %s6968_s5, 1536, %s56_s25, [#allocation7], %s6265_s29, %s6265_s29, %s6266_s30  }
  0x35   :  { %s6211_s23 = scalar_lea.hbm %s6969_s6, 1536 }
  0x36   :  { %p6212_p10 = scmp.ne.s32.totalorder %s6969_s6, %s6211_s23  ;;  %p6215_p11 = scmp.lt.u32.totalorder %s6211_s23, %s6969_s6 }
  0x38   :  { %p6217_p12 = pnand %p6215_p11, %p6212_p10 }
  0x3a   :  { %6220 = shalt.err (!%p6217_p12)
}
  0x3b   :  { %s6221_s28 = scalar_lea.vmem %s6370_s27, 1536  ;;  %p6226_p0 = scmp.lt.s32.totalorder %s6370_s27, %s6370_s27 }
  0x3c   :  { %p6222_p13 = scmp.ne.s32.totalorder %s6370_s27, %s6221_s28  ;;  %p6227_p1 = scmp.lt.s32.totalorder %s6221_s28, %s6221_s28 }
  0x3e   :  { %p6228_p2 = por %p6227_p1, %p6226_p0 }
  0x40   :  { %p6229_p3 = pnand %p6228_p2, %p6222_p13 }
  0x42   :  { %6232 = shalt.err (!%p6229_p3)
}
  0x43   :  { %73 = dma.hbm_to_vmem [thread:$0]  %s6969_s6, 1536, %s6370_s27, [#allocation10], %s6265_s29, %s6265_s29, %s6266_s30  }
  0x44   :  { %6255 = dma.done.wait [#allocation4], 256  }
  0x45   :  { %6256 = vsyncadd [#allocation4], 4294967040 }
  0x46   :  { %6257 = dma.done.wait [#allocation7], 3072  }
  0x47   :  { %6258 = vsyncadd [#allocation7], 4294964224 }
  0x48   :  { %6259 = dma.done.wait [#allocation10], 1536  }
  0x49   :  { %6260 = vsyncadd [#allocation10], 4294965760  ;;  %vm130_vm0 = vcmask 130048   ;;  %v96_v0 = vld [vmem:[%s6964_s1] sm:$0xff]  ;;  %v97_v1 = vld [vmem:[%s6964_s1 + $0x8] sm:$0xff]  ;;  %v6269_v16 = vmov 0.0|0.0  }
  0x4a   :  { %v4673_v2 = vld [vmem:[%s6964_s1 + $0x10] sm:$0xff]  ;;  %v5645_v3 = vpack.c.bf16 %v97_v1, %v96_v0  ;;  %v4674_v4 = vld [vmem:[%s6964_s1 + $0x18] sm:$0xff]  ;;  %v4675_v7 = vld [vmem:[%s6964_s1 + $0x20] sm:$0xff]  ;;  %vm6270_vm1 = vmmov 0   ;;  %v6271_v25 = vmov 0.0   ;;  %vm374_vm2 = vcmask 261120  }
  0x4b   :  { %v94_v5 = vld [vmem:[#allocation3] sm:$0xff]  ;;  %v5649_v6 = vpack.c.bf16 %v4674_v4, %v4673_v2  ;;  %v4676_v8 = vld [vmem:[%s6964_s1 + $0x28] sm:$0xff]  ;;  %v104_v9 = vld [vmem:[#allocation6] sm:$0xff]  ;;  %vm615_vm3 = vcmask 254976   ;;  %vm862_vm4 = vcmask 257026   ;;  %vm1110_vm5 = vcmask 259076  }
  0x4c   :  { %5063 = vmatprep.mubr.msk.f32.mxu1 %vm130_vm0, %v94_v5  ;;  %5056 = vmatprep.mubr.msk.f32.mxu0 %vm130_vm0, %v94_v5  ;;  %v5653_v10 = vpack.c.bf16 %v4676_v8, %v4675_v7  ;;  %v105_v11 = vld [vmem:[#allocation6 + $0x8] sm:$0xff]  ;;  %v95_v12 = vld [vmem:[#allocation3 + $0x8] sm:$0xff]  ;;  %v109_v14 = vld [vmem:[#allocation6 + $0x20] sm:$0xff]  ;;  %vm1358_vm6 = vcmask 261126   ;;  %s6272_s27 = smov [#allocation11]   ;;  %vm4654_vm7 = vcmask 74752  }
  0x4d   :  { %5646 = vmatprep.subr.bf16.mxu0 %v5645_v3  ;;  %5650 = vmatprep.subr.bf16.mxu1 %v5649_v6  ;;  %v6427_v13 = vpack.c.bf16 %v105_v11, %v104_v9  ;;  %v110_v15 = vld [vmem:[#allocation6 + $0x28] sm:$0xff]  ;;  %v106_v17 = vld [vmem:[#allocation6 + $0x10] sm:$0xff]  ;;  %v107_v18 = vld [vmem:[#allocation6 + $0x18] sm:$0xff]  ;;  %s4662_s0 = sshll.u32 %s6272_s27, 4  ;;  %s4663_s0 = int_to_ptr.vmem [resolvable:$true] %s4662_s0 }
  0x4e   :  { %5648 = vmatpush3.bf16.msra.mxu0 %v5645_v3  ;;  %5652 = vmatpush3.bf16.msra.mxu1 %v5649_v6  ;;  %v6432_v19 = vpack.c.bf16 %v110_v15, %v109_v14  ;;  %v6436_v20 = vpack.c.bf16 %v107_v18, %v106_v17  ;;  %v111_v21 = vld [vmem:[#allocation6 + $0x30] sm:$0xff]  ;;  %v112_v22 = vld [vmem:[#allocation6 + $0x38] sm:$0xff]  ;;  %v114_v23 = vld [vmem:[#allocation6 + $0x40] sm:$0xff]  ;;  %s6233_s20 = scalar_lea.vmem %s4663_s0, 32  ;;  %p6238_p5 = scmp.lt.s32.totalorder %s4663_s0, %s4663_s0 }
  0x4f   :  { %5654 = vmatprep.subr.bf16.mxu0 %v5653_v10  ;;  %5657 = vmatprep.subr.bf16.mxu1 %v6269_v16  ;;  %v115_v24 = vld [vmem:[#allocation6 + $0x48] sm:$0xff]  ;;  %v6444_v26 = vpack.c.bf16 %v112_v22, %v111_v21  ;;  %v116_v28 = vld [vmem:[#allocation6 + $0x50] sm:$0xff]  ;;  %v117_v29 = vld [vmem:[#allocation6 + $0x58] sm:$0xff]  ;;  %p6234_p4 = scmp.ne.s32.totalorder %s4663_s0, %s6233_s20  ;;  %p6239_p6 = scmp.lt.s32.totalorder %s6233_s20, %s6233_s20 }
  0x50   :  { %v6450_v27 = vpack.c.bf16 %v115_v24, %v114_v23  ;;  %v6456_v30 = vpack.c.bf16 %v117_v29, %v116_v28  ;;  %v4679_v31 = vld [vmem:[%s6966_s3] ss:$0 sm:$0xff]  ;;  %v4682_v32 = vld [vmem:[%s6966_s3 + $0x1] ss:$0 sm:$0xff] }
  0x51   :  { %5057 = vmatmul.mubr.msk.f32.vlgmr.msra.gmra.mrb[0].mxu0 %vm130_vm0, %v95_v12  ;;  %5064 = vmatmul.mubr.msk.f32.vlgmr.msra.gmra.mrb[0].mxu1 %vm130_vm0, %v95_v12  ;;  %v4685_v39 = vld [vmem:[%s6967_s4] ss:$0 sm:$0xff]  ;;  %v6502_v58 = vld [vmem:[%s6967_s4 + $0x1] ss:$0 sm:$0xff]  ;;  %p6240_p7 = por %p6239_p6, %p6238_p5 }
  0x52   :  { %5656 = vmatpush3.bf16.msra.mxu0 %v5653_v10  ;;  %5659 = vmatpush3.bf16.msra.mxu1 %v6427_v13 }
  0x53   :  { %5070 = vmatprep.mubr.msk.f32.mxu0 %vm130_vm0, %v94_v5  ;;  %5660 = vmatprep.subr.bf16.mxu1 %v6269_v16  ;;  %p6241_p8 = pnand %p6240_p7, %p6234_p4 }
  0x54   :  { %5663 = vmatprep.subr.bf16.mxu0 %v6269_v16  ;;  %5081 = vmatprep.mubr.msk.f32.mxu1 %vm6270_vm1, %v6271_v25 }
  0x55   :  { %5071 = vmatmul.mubr.msk.f32.vlgmr.msra.gmra.mrb[2].mxu0 %vm130_vm0, %v95_v12 }
  0x56   :  { %5665 = vmatpush3.bf16.msra.mxu0 %v6432_v19  ;;  %5092 = vmatprep.mubr.msk.f32.mxu0 %vm6270_vm1, %v6271_v25 }
  0x57   :  { %5662 = vmatpush3.bf16.msra.mxu1 %v6436_v20  ;;  %5666 = vmatprep.subr.bf16.mxu0 %v6269_v16 }
  0x58   :  { %5669 = vmatprep.subr.bf16.mxu1 %v6269_v16 }
  0x5a   :  { %5082 = vmatmul.mubr.f32.vlgmr.msra.gmra.mrb[2].mxu1 %v6271_v25  ;;  %5668 = vmatpush3.bf16.msra.mxu0 %v6444_v26 }
  0x5b   :  { %5671 = vmatpush3.bf16.msra.mxu1 %v6450_v27  ;;  %5103 = vmatprep.mubr.msk.f32.mxu1 %vm6270_vm1, %v6271_v25 }
  0x5c   :  { %5672 = vmatprep.subr.bf16.mxu1 %v6269_v16  ;;  %5675 = vmatprep.subr.bf16.mxu0 %v6269_v16 }
  0x5d   :  { %5093 = vmatmul.mubr.f32.vlgmr.msra.gmra.mrb[4].mxu0 %v6271_v25 }
  0x5e   :  { %5677 = vmatpush3.bf16.msra.mxu0 %v6427_v13  ;;  %5114 = vmatprep.mubr.msk.f32.mxu0 %vm6270_vm1, %v6271_v25 }
  0x5f   :  { %5674 = vmatpush3.bf16.msra.mxu1 %v6456_v30  ;;  %5678 = vmatprep.subr.bf16.mxu0 %v6269_v16 }
  0x60   :  { %5681 = vmatprep.subr.bf16.mxu1 %v6269_v16 }
  0x62   :  { %5104 = vmatmul.mubr.f32.vlgmr.msra.gmra.mrb[4].mxu1 %v6271_v25  ;;  %5680 = vmatpush3.bf16.msra.mxu0 %v6436_v20 }
  0x63   :  { %5683 = vmatpush3.bf16.msra.mxu1 %v6432_v19  ;;  %5125 = vmatprep.mubr.msk.f32.mxu1 %vm6270_vm1, %v6271_v25 }
  0x64   :  { %5684 = vmatprep.subr.bf16.mxu1 %v6269_v16  ;;  %5687 = vmatprep.subr.bf16.mxu0 %v6269_v16 }
  0x67   :  { %5686 = vmatpush3.bf16.msra.mxu1 %v6444_v26 }
  0x68   :  { %5693 = vmatprep.subr.bf16.mxu1 %v6269_v16 }
 0x124   :  { %v5058_v33 = vpop.f32.mrb[0].mxu0  ;;  %v5065_v34 = vpop.f32.mrb[0].mxu1 }
 0x125   :  { %v6484_v35 = vadd.f32 %v5058_v33, %v4679_v31  ;;  %v203_v36 = vpop.f32.mrb[1].mxu0  ;;  %v6486_v37 = vadd.f32 %v5065_v34, %v4682_v32  ;;  %v284_v38 = vpop.f32.mrb[1].mxu1 }
 0x126   :  { %v6493_v43 = vadd.f32 %v4679_v31, %v203_v36  ;;  %v6496_v47 = vadd.f32 %v4682_v32, %v284_v38 }
 0x128   :  { %v5072_v40 = vpop.f32.mrb[2].mxu0 }
 0x129   :  { %v6491_v41 = vadd.f32 %v5072_v40, %v4685_v39  ;;  %v365_v42 = vpop.f32.mrb[3].mxu0 }
 0x12a   :  { %v6505_v62 = vadd.f32 %v4685_v39, %v365_v42 }
 0x12d   :  { %v444_v44 = vpop.f32.mrb[2].mxu1 }
 0x12e   :  { %v594_v45 = vadd.f32 %v444_v44, %v6493_v43  ;;  %v5083_v46 = vpop.f32.mrb[3].mxu1 }
 0x130   :  { %v4689_v48 = vmul.f32 -1.442695, %v594_v45  ;;  %v514_v49 = vpop.f32.mrb[4].mxu0 }
 0x131   :  { %v601_v50 = vadd.f32 %v514_v49, %v6496_v47  ;;  %v5094_v51 = vpop.f32.mrb[5].mxu0 }
 0x132   :  { %5985 = vpow2.f32 %v4689_v48 }
 0x133   :  { %v4690_v52 = vmul.f32 -1.442695, %v601_v50 }
 0x135   :  { %v590_v53 = vpop.f32.mrb[4].mxu1  ;;  %5987 = vpow2.f32 %v4690_v52 }
 0x136   :  { %v5105_v54 = vpop.f32.mrb[5].mxu1  ;;  %v591_v60 = vadd.f32 %v6502_v58, %v590_v53 }
 0x13c   :  { %v5986_v55 = vpop.eup %5985 }
 0x13d   :  { %v598_v56 = vadd.f32 1.0, %v5986_v55 }
 0x13f   :  { %5989 = vrcp.f32 %v598_v56  ;;  %v5988_v57 = vpop.eup %5987 }
 0x140   :  { %v605_v59 = vadd.f32 1.0, %v5988_v57 }
 0x142   :  { %5991 = vrcp.f32 %v605_v59 }
 0x149   :  { %v5990_v61 = vpop.eup %5989 }
 0x14a   :  { %v608_v63 = vmul.f32 %v5990_v61, %v591_v60 }
 0x14c   :  { %v609_v0 = vadd.f32 %v608_v63, %v6505_v62  ;;  %v5992_v1 = vpop.eup %5991 }
 0x14d   :  { %v611_v2 = vsub.f32 1.0, %v5992_v1  ;;  %v613_v5 = vmul.f32 0.0, %v5992_v1 }
 0x14e   :  { %5993 = vtanh.f32 %v609_v0 }
 0x158   :  { %v5994_v3 = vpop.eup %5993 }
 0x159   :  { %v612_v4 = vmul.f32 %v5994_v3, %v611_v2 }
 0x15b   :  { %v614_v6 = vadd.f32 %v613_v5, %v612_v4 }
 0x15d   :  { %616 = vst.msk [vmem:[#allocation2] sm:$0x3] %vm615_vm3, %v614_v6  ;;  %5115 = vmatmul.mubr.msk.f32.vlgmr.msra.gmra.mrb[6].mxu0 %vm374_vm2, %v614_v6  ;;  %5126 = vmatmul.mubr.msk.f32.vlgmr.msra.gmra.mrb[6].mxu1 %vm374_vm2, %v614_v6  ;;  %v858_v34 = vrot.slane %v614_v6, 6 }
 0x15e   :  { %5689 = vmatpush3.bf16.msra.mxu0 %v6450_v27  ;;  %5136 = vmatprep.mubr.msk.f32.mxu0 %vm6270_vm1, %v6271_v25 }
 0x15f   :  { %5690 = vmatprep.subr.bf16.mxu0 %v6269_v16  ;;  %5695 = vmatpush3.bf16.msra.mxu1 %v6427_v13 }
 0x160   :  { %5696 = vmatprep.subr.bf16.mxu1 %v6269_v16  ;;  %5147 = vmatprep.mubr.msk.f32.mxu1 %vm6270_vm1, %v6271_v25 }
 0x162   :  { %5692 = vmatpush3.bf16.msra.mxu0 %v6456_v30 }
 0x163   :  { %5699 = vmatprep.subr.bf16.mxu0 %v6269_v16  ;;  %5698 = vmatpush3.bf16.msra.mxu1 %v6436_v20 }
 0x164   :  { %5705 = vmatprep.subr.bf16.mxu1 %v6269_v16 }
 0x165   :  { %5137 = vmatmul.mubr.msk.f32.vlgmr.msra.gmra.mrb[8].mxu0 %vm374_vm2, %v614_v6 }
 0x166   :  { %5701 = vmatpush3.bf16.msra.mxu0 %v6432_v19  ;;  %5158 = vmatprep.mubr.msk.f32.mxu0 %vm6270_vm1, %v6271_v25 }
 0x167   :  { %5702 = vmatprep.subr.bf16.mxu0 %v6269_v16 }
 0x16a   :  { %5704 = vmatpush3.bf16.msra.mxu0 %v6444_v26 }
 0x16b   :  { %5711 = vmatprep.subr.bf16.mxu0 %v6269_v16 }
 0x230   :  { %v686_v7 = vpop.f32.mrb[6].mxu0  ;;  %v756_v8 = vpop.f32.mrb[6].mxu1 }
 0x231   :  { %v831_v9 = vrot.slane %v686_v7, 6  ;;  %v841_v10 = vrot.slane %v756_v8, 6  ;;  %v5116_v11 = vpop.f32.mrb[7].mxu0  ;;  %v5127_v12 = vpop.f32.mrb[7].mxu1 }
 0x233   :  { %v833_v14 = vadd.f32 %v831_v9, %v6493_v43  ;;  %v843_v15 = vadd.f32 %v841_v10, %v6496_v47 }
 0x235   :  { %v4694_v17 = vmul.f32 -1.442695, %v833_v14  ;;  %v4695_v18 = vmul.f32 -1.442695, %v843_v15 }
 0x237   :  { %5995 = vpow2.f32 %v4694_v17 }
 0x238   :  { %5997 = vpow2.f32 %v4695_v18  ;;  %v826_v21 = vpop.f32.mrb[8].mxu0 }
 0x239   :  { %v5138_v22 = vpop.f32.mrb[9].mxu0  ;;  %v827_v31 = vadd.f32 %v6502_v58, %v826_v21 }
 0x23b   :  { %v851_v32 = vrot.slane %v827_v31, 6 }
 0x241   :  { %v5996_v23 = vpop.eup %5995 }
 0x242   :  { %v5998_v24 = vpop.eup %5997  ;;  %v837_v28 = vadd.f32 1.0, %v5996_v23 }
 0x243   :  { %v847_v29 = vadd.f32 1.0, %v5998_v24 }
 0x244   :  { %5999 = vrcp.f32 %v837_v28 }
 0x245   :  { %6001 = vrcp.f32 %v847_v29 }
 0x24e   :  { %v6000_v33 = vpop.eup %5999 }
 0x24f   :  { %v6002_v36 = vpop.eup %6001  ;;  %v853_v38 = vmul.f32 %v6000_v33, %v851_v32 }
 0x250   :  { %v860_v39 = vmul.f32 %v6002_v36, %v858_v34  ;;  %v856_v42 = vsub.f32 1.0, %v6002_v36 }
 0x251   :  { %v854_v40 = vadd.f32 %v853_v38, %v6505_v62 }
 0x253   :  { %6003 = vtanh.f32 %v854_v40 }
 0x25d   :  { %v6004_v44 = vpop.eup %6003 }
 0x25e   :  { %v857_v45 = vmul.f32 %v6004_v44, %v856_v42 }
 0x260   :  { %v861_v46 = vadd.f32 %v860_v39, %v857_v45 }
 0x262   :  { %863 = vst.msk [vmem:[#allocation2] sm:$0xc] %vm862_vm4, %v861_v46  ;;  %v865_v48 = vrot.slane %v861_v46, 2  ;;  %v1106_v6 = vrot.slane %v861_v46, 6 }
 0x264   :  { %5148 = vmatmul.mubr.msk.f32.vlgmr.msra.gmra.mrb[8].mxu1 %vm374_vm2, %v865_v48  ;;  %5159 = vmatmul.mubr.msk.f32.vlgmr.msra.gmra.mrb[10].mxu0 %vm374_vm2, %v865_v48 }
 0x265   :  { %5707 = vmatpush3.bf16.msra.mxu1 %v6450_v27  ;;  %5169 = vmatprep.mubr.msk.f32.mxu1 %vm6270_vm1, %v6271_v25 }
 0x266   :  { %5708 = vmatprep.subr.bf16.mxu1 %v6269_v16  ;;  %5713 = vmatpush3.bf16.msra.mxu0 %v6427_v13 }
 0x267   :  { %5714 = vmatprep.subr.bf16.mxu0 %v6269_v16  ;;  %5180 = vmatprep.mubr.msk.f32.mxu0 %vm6270_vm1, %v6271_v25 }
 0x269   :  { %5710 = vmatpush3.bf16.msra.mxu1 %v6456_v30 }
 0x26a   :  { %5717 = vmatprep.subr.bf16.mxu1 %v6269_v16  ;;  %5716 = vmatpush3.bf16.msra.mxu0 %v6436_v20 }
 0x26b   :  { %5723 = vmatprep.subr.bf16.mxu0 %v6269_v16 }
 0x26c   :  { %5170 = vmatmul.mubr.msk.f32.vlgmr.msra.gmra.mrb[10].mxu1 %vm374_vm2, %v865_v48 }
 0x26d   :  { %5719 = vmatpush3.bf16.msra.mxu1 %v6432_v19  ;;  %5191 = vmatprep.mubr.msk.f32.mxu1 %vm6270_vm1, %v6271_v25 }
 0x26e   :  { %5720 = vmatprep.subr.bf16.mxu1 %v6269_v16 }
 0x271   :  { %5722 = vmatpush3.bf16.msra.mxu1 %v6444_v26 }
 0x272   :  { %5729 = vmatprep.subr.bf16.mxu1 %v6269_v16 }
 0x337   :  { %v934_v49 = vpop.f32.mrb[8].mxu1  ;;  %v1004_v50 = vpop.f32.mrb[10].mxu0 }
 0x338   :  { %v1079_v51 = vrot.slane %v934_v49, 4  ;;  %v1089_v52 = vrot.slane %v1004_v50, 4  ;;  %v5149_v53 = vpop.f32.mrb[9].mxu1  ;;  %v5160_v54 = vpop.f32.mrb[11].mxu0 }
 0x33a   :  { %v1081_v55 = vadd.f32 %v1079_v51, %v6493_v43  ;;  %v1091_v56 = vadd.f32 %v1089_v52, %v6496_v47 }
 0x33c   :  { %v4699_v57 = vmul.f32 -1.442695, %v1081_v55  ;;  %v4700_v59 = vmul.f32 -1.442695, %v1091_v56 }
 0x33e   :  { %6005 = vpow2.f32 %v4699_v57 }
 0x33f   :  { %6007 = vpow2.f32 %v4700_v59  ;;  %v1074_v60 = vpop.f32.mrb[10].mxu1 }
 0x340   :  { %v5171_v61 = vpop.f32.mrb[11].mxu1  ;;  %v1075_v3 = vadd.f32 %v6502_v58, %v1074_v60 }
 0x342   :  { %v1099_v4 = vrot.slane %v1075_v3, 4 }
 0x348   :  { %v6006_v63 = vpop.eup %6005 }
 0x349   :  { %v6008_v0 = vpop.eup %6007  ;;  %v1085_v1 = vadd.f32 1.0, %v6006_v63 }
 0x34a   :  { %v1095_v2 = vadd.f32 1.0, %v6008_v0 }
 0x34b   :  { %6009 = vrcp.f32 %v1085_v1 }
 0x34c   :  { %6011 = vrcp.f32 %v1095_v2 }
 0x355   :  { %v6010_v5 = vpop.eup %6009 }
 0x356   :  { %v6012_v7 = vpop.eup %6011  ;;  %v1101_v8 = vmul.f32 %v6010_v5, %v1099_v4 }
 0x357   :  { %v1108_v9 = vmul.f32 %v6012_v7, %v1106_v6  ;;  %v1104_v11 = vsub.f32 1.0, %v6012_v7 }
 0x358   :  { %v1102_v10 = vadd.f32 %v1101_v8, %v6505_v62 }
 0x35a   :  { %6013 = vtanh.f32 %v1102_v10 }
 0x364   :  { %v6014_v12 = vpop.eup %6013 }
 0x365   :  { %v1105_v14 = vmul.f32 %v6014_v12, %v1104_v11 }
 0x367   :  { %v1109_v15 = vadd.f32 %v1108_v9, %v1105_v14 }
 0x369   :  { %1111 = vst.msk [vmem:[#allocation2] sm:$0x30] %vm1110_vm5, %v1109_v15  ;;  %v1113_v17 = vrot.slane %v1109_v15, 4  ;;  %v1354_v48 = vrot.slane %v1109_v15, 6 }
 0x36b   :  { %5181 = vmatmul.mubr.msk.f32.vlgmr.msra.gmra.mrb[12].mxu0 %vm374_vm2, %v1113_v17  ;;  %5192 = vmatmul.mubr.msk.f32.vlgmr.msra.gmra.mrb[12].mxu1 %vm374_vm2, %v1113_v17 }
 0x36c   :  { %5725 = vmatpush3.bf16.msra.mxu0 %v6450_v27  ;;  %5202 = vmatprep.mubr.msk.f32.mxu0 %vm6270_vm1, %v6271_v25 }
 0x36d   :  { %5726 = vmatprep.subr.bf16.mxu0 %v6269_v16  ;;  %5731 = vmatpush3.bf16.msra.mxu1 %v6427_v13 }
 0x36e   :  { %5732 = vmatprep.subr.bf16.mxu1 %v6269_v16  ;;  %5213 = vmatprep.mubr.msk.f32.mxu1 %vm6270_vm1, %v6271_v25 }
 0x370   :  { %5728 = vmatpush3.bf16.msra.mxu0 %v6456_v30 }
 0x371   :  { %5735 = vmatprep.subr.bf16.mxu0 %v6269_v16  ;;  %5734 = vmatpush3.bf16.msra.mxu1 %v6436_v20 }
 0x372   :  { %5741 = vmatprep.subr.bf16.mxu1 %v6269_v16 }
 0x373   :  { %5203 = vmatmul.mubr.msk.f32.vlgmr.msra.gmra.mrb[14].mxu0 %vm374_vm2, %v1113_v17 }
 0x374   :  { %5737 = vmatpush3.bf16.msra.mxu0 %v6432_v19  ;;  %5224 = vmatprep.mubr.msk.f32.mxu0 %vm6270_vm1, %v6271_v25 }
 0x375   :  { %5738 = vmatprep.subr.bf16.mxu0 %v6269_v16 }
 0x378   :  { %5740 = vmatpush3.bf16.msra.mxu0 %v6444_v26 }
 0x379   :  { %5747 = vmatprep.subr.bf16.mxu0 %v6269_v16 }
 0x43e   :  { %v1182_v18 = vpop.f32.mrb[12].mxu0  ;;  %v1252_v21 = vpop.f32.mrb[12].mxu1 }
 0x43f   :  { %v1327_v22 = vrot.slane %v1182_v18, 2  ;;  %v1337_v23 = vrot.slane %v1252_v21, 2  ;;  %v5182_v24 = vpop.f32.mrb[13].mxu0  ;;  %v5193_v28 = vpop.f32.mrb[13].mxu1 }
 0x441   :  { %v1329_v29 = vadd.f32 %v1327_v22, %v6493_v43  ;;  %v1339_v31 = vadd.f32 %v1337_v23, %v6496_v47 }
 0x443   :  { %v4704_v32 = vmul.f32 -1.442695, %v1329_v29  ;;  %v4705_v33 = vmul.f32 -1.442695, %v1339_v31 }
 0x445   :  { %6015 = vpow2.f32 %v4704_v32 }
 0x446   :  { %6017 = vpow2.f32 %v4705_v33  ;;  %v1322_v34 = vpop.f32.mrb[14].mxu0 }
 0x447   :  { %v5204_v36 = vpop.f32.mrb[15].mxu0  ;;  %v1323_v44 = vadd.f32 %v6502_v58, %v1322_v34 }
 0x449   :  { %v1347_v45 = vrot.slane %v1323_v44, 2 }
 0x44f   :  { %v6016_v38 = vpop.eup %6015 }
 0x450   :  { %v6018_v39 = vpop.eup %6017  ;;  %v1333_v40 = vadd.f32 1.0, %v6016_v38 }
 0x451   :  { %v1343_v42 = vadd.f32 1.0, %v6018_v39 }
 0x452   :  { %6019 = vrcp.f32 %v1333_v40 }
 0x453   :  { %6021 = vrcp.f32 %v1343_v42 }
 0x45c   :  { %v6020_v46 = vpop.eup %6019 }
 0x45d   :  { %v6022_v43 = vpop.eup %6021  ;;  %v1349_v49 = vmul.f32 %v6020_v46, %v1347_v45 }
 0x45e   :  { %v1356_v47 = vmul.f32 %v6022_v43, %v1354_v48  ;;  %v1352_v51 = vsub.f32 1.0, %v6022_v43 }
 0x45f   :  { %v1350_v50 = vadd.f32 %v1349_v49, %v6505_v62 }
 0x461   :  { %6023 = vtanh.f32 %v1350_v50 }
 0x46b   :  { %v6024_v52 = vpop.eup %6023 }
 0x46c   :  { %v1353_v53 = vmul.f32 %v6024_v52, %v1352_v51 }
 0x46e   :  { %v1357_v54 = vadd.f32 %v1356_v47, %v1353_v53 }
 0x470   :  { %1359 = vst.msk [vmem:[#allocation2] sm:$0xc0] %vm1358_vm6, %v1357_v54  ;;  %v1361_v55 = vrot.slane %v1357_v54, 6 }
 0x472   :  { %5214 = vmatmul.mubr.msk.f32.vlgmr.msra.gmra.mrb[14].mxu1 %vm374_vm2, %v1361_v55  ;;  %5225 = vmatmul.mubr.msk.f32.vlgmr.msra.gmra.mrb[16].mxu0 %vm374_vm2, %v1361_v55 }
 0x473   :  { %5743 = vmatpush3.bf16.msra.mxu1 %v6450_v27  ;;  %5235 = vmatprep.mubr.msk.f32.mxu1 %vm6270_vm1, %v6271_v25 }
 0x474   :  { %5744 = vmatprep.subr.bf16.mxu1 %v6269_v16  ;;  %5749 = vmatpush3.bf16.msra.mxu0 %v6427_v13 }
 0x475   :  { %5750 = vmatprep.subr.bf16.mxu0 %v6269_v16  ;;  %5246 = vmatprep.mubr.msk.f32.mxu0 %vm6270_vm1, %v6271_v25 }
 0x477   :  { %5746 = vmatpush3.bf16.msra.mxu1 %v6456_v30 }
 0x478   :  { %5753 = vmatprep.subr.bf16.mxu1 %v6269_v16  ;;  %5752 = vmatpush3.bf16.msra.mxu0 %v6436_v20 }
 0x479   :  { %5759 = vmatprep.subr.bf16.mxu0 %v6269_v16 }
 0x47a   :  { %5236 = vmatmul.mubr.msk.f32.vlgmr.msra.gmra.mrb[16].mxu1 %vm374_vm2, %v1361_v55 }
 0x47b   :  { %5755 = vmatpush3.bf16.msra.mxu1 %v6432_v19  ;;  %5257 = vmatprep.mubr.msk.f32.mxu1 %vm6270_vm1, %v6271_v25 }
 0x47c   :  { %5756 = vmatprep.subr.bf16.mxu1 %v6269_v16 }
 0x47f   :  { %5758 = vmatpush3.bf16.msra.mxu1 %v6444_v26 }
 0x480   :  { %5765 = vmatprep.subr.bf16.mxu1 %v6269_v16 }
 0x545   :  { %v1430_v62 = vpop.f32.mrb[14].mxu1  ;;  %v1500_v56 = vpop.f32.mrb[16].mxu0 }
 0x546   :  { %v1574_v57 = vadd.f32 %v1430_v62, %v6484_v35  ;;  %v5215_v59 = vpop.f32.mrb[15].mxu1  ;;  %v5226_v60 = vpop.f32.mrb[17].mxu0  ;;  %v1581_v63 = vadd.f32 %v1500_v56, %v6486_v37 }
 0x548   :  { %v4709_v61 = vmul.f32 -1.442695, %v1574_v57  ;;  %v4710_v0 = vmul.f32 -1.442695, %v1581_v63 }
 0x54a   :  { %6025 = vpow2.f32 %v4709_v61 }
 0x54b   :  { %6027 = vpow2.f32 %v4710_v0 }
 0x54d   :  { %v1570_v1 = vpop.f32.mrb[16].mxu1 }
 0x54e   :  { %v5237_v2 = vpop.f32.mrb[17].mxu1  ;;  %v1571_v7 = vadd.f32 %v6502_v58, %v1570_v1 }
 0x554   :  { %v6026_v3 = vpop.eup %6025 }
 0x555   :  { %v1578_v4 = vadd.f32 1.0, %v6026_v3  ;;  %v6028_v5 = vpop.eup %6027 }
 0x556   :  { %v1585_v6 = vadd.f32 1.0, %v6028_v5 }
 0x557   :  { %6029 = vrcp.f32 %v1578_v4 }
 0x558   :  { %6031 = vrcp.f32 %v1585_v6 }
 0x561   :  { %v6030_v8 = vpop.eup %6029 }
 0x562   :  { %v1588_v9 = vmul.f32 %v6030_v8, %v1571_v7  ;;  %v6032_v11 = vpop.eup %6031 }
 0x563   :  { %v1591_v12 = vsub.f32 1.0, %v6032_v11  ;;  %v1594_v17 = vmul.f32 %v6032_v11, %v1361_v55 }
 0x564   :  { %v1589_v10 = vadd.f32 %v1588_v9, %v6491_v41 }
 0x566   :  { %6033 = vtanh.f32 %v1589_v10 }
 0x570   :  { %v6034_v14 = vpop.eup %6033 }
 0x571   :  { %v1592_v15 = vmul.f32 %v6034_v14, %v1591_v12 }
 0x573   :  { %v1595_v18 = vadd.f32 %v1594_v17, %v1592_v15 }
 0x575   :  { %1596 = vst.msk [vmem:[#allocation2 + $0x8] sm:$0x3] %vm615_vm3, %v1595_v18  ;;  %5247 = vmatmul.mubr.msk.f32.vlgmr.msra.gmra.mrb[18].mxu0 %vm374_vm2, %v1595_v18  ;;  %5258 = vmatmul.mubr.msk.f32.vlgmr.msra.gmra.mrb[18].mxu1 %vm374_vm2, %v1595_v18  ;;  %v1838_v43 = vrot.slane %v1595_v18, 6 }
 0x576   :  { %5761 = vmatpush3.bf16.msra.mxu0 %v6450_v27  ;;  %5268 = vmatprep.mubr.msk.f32.mxu0 %vm6270_vm1, %v6271_v25 }
 0x577   :  { %5762 = vmatprep.subr.bf16.mxu0 %v6269_v16  ;;  %5767 = vmatpush3.bf16.msra.mxu1 %v6427_v13 }
 0x578   :  { %5768 = vmatprep.subr.bf16.mxu1 %v6269_v16  ;;  %5279 = vmatprep.mubr.msk.f32.mxu1 %vm6270_vm1, %v6271_v25 }
 0x57a   :  { %5764 = vmatpush3.bf16.msra.mxu0 %v6456_v30 }
 0x57b   :  { %5771 = vmatprep.subr.bf16.mxu0 %v6269_v16  ;;  %5770 = vmatpush3.bf16.msra.mxu1 %v6436_v20 }
 0x57c   :  { %5777 = vmatprep.subr.bf16.mxu1 %v6269_v16 }
 0x57d   :  { %5269 = vmatmul.mubr.msk.f32.vlgmr.msra.gmra.mrb[20].mxu0 %vm374_vm2, %v1595_v18 }
 0x57e   :  { %5773 = vmatpush3.bf16.msra.mxu0 %v6432_v19  ;;  %5290 = vmatprep.mubr.msk.f32.mxu0 %vm6270_vm1, %v6271_v25 }
 0x57f   :  { %5774 = vmatprep.subr.bf16.mxu0 %v6269_v16 }
 0x582   :  { %5776 = vmatpush3.bf16.msra.mxu0 %v6444_v26 }
 0x583   :  { %5783 = vmatprep.subr.bf16.mxu0 %v6269_v16 }
 0x648   :  { %v1666_v21 = vpop.f32.mrb[18].mxu0  ;;  %v1736_v22 = vpop.f32.mrb[18].mxu1 }
 0x649   :  { %v1811_v23 = vrot.slane %v1666_v21, 6  ;;  %v1821_v24 = vrot.slane %v1736_v22, 6  ;;  %v5248_v28 = vpop.f32.mrb[19].mxu0  ;;  %v5259_v29 = vpop.f32.mrb[19].mxu1 }
 0x64a   :  { %v2340_v28 = vld [vmem:[#allocation8 + $0x8] sm:$0xff]  ;;  %v2344_v29 = vld [vmem:[#allocation8 + $0x20] sm:$0xff] }
 0x64b   :  { %v1813_v31 = vadd.f32 %v1811_v23, %v6484_v35  ;;  %v1823_v32 = vadd.f32 %v1821_v24, %v6486_v37  ;;  %v6670_v23 = vld [vmem:[#allocation2] sm:$0xff] }
 0x64c   :  { %v2339_v24 = vld [vmem:[#allocation8] sm:$0xff] }
 0x64d   :  { %v4714_v33 = vmul.f32 -1.442695, %v1813_v31  ;;  %v4715_v34 = vmul.f32 -1.442695, %v1823_v32  ;;  %v5801_v31 = vpack.c.bf16 %v2340_v28, %v2339_v24  ;;  %v2366_v24 = vld [vmem:[#allocation9 + $0x58] sm:$0xff] }
 0x64f   :  { %6035 = vpow2.f32 %v4714_v33  ;;  %v2341_v33 = vld [vmem:[#allocation8 + $0x10] sm:$0xff] }
 0x650   :  { %6037 = vpow2.f32 %v4715_v34  ;;  %v1806_v36 = vpop.f32.mrb[20].mxu0  ;;  %v2342_v34 = vld [vmem:[#allocation8 + $0x18] sm:$0xff] }
 0x651   :  { %v5270_v38 = vpop.f32.mrb[21].mxu0  ;;  %v1807_v45 = vadd.f32 %v6502_v58, %v1806_v36  ;;  %v2346_v36 = vld [vmem:[#allocation8 + $0x30] sm:$0xff] }
 0x652   :  { %v5805_v38 = vpack.c.bf16 %v2342_v34, %v2341_v33 }
 0x653   :  { %v1831_v46 = vrot.slane %v1807_v45, 6 }
 0x659   :  { %v6036_v39 = vpop.eup %6035 }
 0x65a   :  { %v6038_v40 = vpop.eup %6037  ;;  %v1817_v42 = vadd.f32 1.0, %v6036_v39  ;;  %v2347_v39 = vld [vmem:[#allocation8 + $0x38] sm:$0xff] }
 0x65b   :  { %v1827_v44 = vadd.f32 1.0, %v6038_v40  ;;  %v2350_v40 = vld [vmem:[#allocation8 + $0x48] sm:$0xff] }
 0x65c   :  { %6039 = vrcp.f32 %v1817_v42  ;;  %v5813_v42 = vpack.c.bf16 %v2347_v39, %v2346_v36 }
 0x65d   :  { %6041 = vrcp.f32 %v1827_v44 }
 0x666   :  { %v6040_v48 = vpop.eup %6039 }
 0x667   :  { %v6042_v49 = vpop.eup %6041  ;;  %v1833_v47 = vmul.f32 %v6040_v48, %v1831_v46 }
 0x668   :  { %v1840_v50 = vmul.f32 %v6042_v49, %v1838_v43  ;;  %v1836_v52 = vsub.f32 1.0, %v6042_v49 }
 0x669   :  { %v1834_v51 = vadd.f32 %v1833_v47, %v6491_v41 }
 0x66b   :  { %6043 = vtanh.f32 %v1834_v51 }
 0x675   :  { %v6044_v53 = vpop.eup %6043 }
 0x676   :  { %v1837_v54 = vmul.f32 %v6044_v53, %v1836_v52 }
 0x678   :  { %v1841_v55 = vadd.f32 %v1840_v50, %v1837_v54 }
 0x67a   :  { %1842 = vst.msk [vmem:[#allocation2 + $0x8] sm:$0xc] %vm862_vm4, %v1841_v55  ;;  %v1844_v62 = vrot.slane %v1841_v55, 2  ;;  %v2085_v9 = vrot.slane %v1841_v55, 6 }
 0x67c   :  { %5280 = vmatmul.mubr.msk.f32.vlgmr.msra.gmra.mrb[20].mxu1 %vm374_vm2, %v1844_v62  ;;  %5291 = vmatmul.mubr.msk.f32.vlgmr.msra.gmra.mrb[22].mxu0 %vm374_vm2, %v1844_v62 }
 0x67d   :  { %5779 = vmatpush3.bf16.msra.mxu1 %v6450_v27  ;;  %5301 = vmatprep.mubr.msk.f32.mxu1 %vm6270_vm1, %v6271_v25 }
 0x67e   :  { %5780 = vmatprep.subr.bf16.mxu1 %v6269_v16  ;;  %5785 = vmatpush3.bf16.msra.mxu0 %v6427_v13 }
 0x67f   :  { %5786 = vmatprep.subr.bf16.mxu0 %v6269_v16  ;;  %5312 = vmatprep.mubr.msk.f32.mxu0 %vm6270_vm1, %v6271_v25 }
 0x681   :  { %5782 = vmatpush3.bf16.msra.mxu1 %v6456_v30 }
 0x682   :  { %5789 = vmatprep.subr.bf16.mxu1 %v6269_v16  ;;  %5788 = vmatpush3.bf16.msra.mxu0 %v6436_v20 }
 0x683   :  { %5795 = vmatprep.subr.bf16.mxu0 %v6269_v16 }
 0x684   :  { %5302 = vmatmul.mubr.msk.f32.vlgmr.msra.gmra.mrb[22].mxu1 %vm374_vm2, %v1844_v62 }
 0x685   :  { %5791 = vmatpush3.bf16.msra.mxu1 %v6432_v19  ;;  %5323 = vmatprep.mubr.msk.f32.mxu1 %vm6270_vm1, %v6271_v25 }
 0x686   :  { %5792 = vmatprep.subr.bf16.mxu1 %v6269_v16 }
 0x689   :  { %5794 = vmatpush3.bf16.msra.mxu1 %v6444_v26 }
 0x68a   :  { %5802 = vmatprep.subr.bf16.mxu1 %v5801_v31 }
 0x74f   :  { %v1913_v13 = vpop.f32.mrb[20].mxu1  ;;  %v1983_v56 = vpop.f32.mrb[22].mxu0 }
 0x750   :  { %v2058_v57 = vrot.slane %v1913_v13, 4  ;;  %v2068_v59 = vrot.slane %v1983_v56, 4  ;;  %v5281_v60 = vpop.f32.mrb[21].mxu1  ;;  %v5292_v61 = vpop.f32.mrb[23].mxu0 }
 0x752   :  { %v2060_v20 = vadd.f32 %v2058_v57, %v6484_v35  ;;  %v2070_v63 = vadd.f32 %v2068_v59, %v6486_v37 }
 0x754   :  { %v4719_v0 = vmul.f32 -1.442695, %v2060_v20  ;;  %v4720_v1 = vmul.f32 -1.442695, %v2070_v63 }
 0x756   :  { %6045 = vpow2.f32 %v4719_v0 }
 0x757   :  { %6047 = vpow2.f32 %v4720_v1  ;;  %v2053_v19 = vpop.f32.mrb[22].mxu1 }
 0x758   :  { %v5303_v2 = vpop.f32.mrb[23].mxu1  ;;  %v2054_v6 = vadd.f32 %v6502_v58, %v2053_v19 }
 0x75a   :  { %v2078_v7 = vrot.slane %v2054_v6, 4 }
 0x760   :  { %v6046_v3 = vpop.eup %6045 }
 0x761   :  { %v6048_v4 = vpop.eup %6047  ;;  %v2064_v5 = vadd.f32 1.0, %v6046_v3 }
 0x762   :  { %v2074_v26 = vadd.f32 1.0, %v6048_v4  ;;  %v2353_v4 = vld [vmem:[#allocation9] sm:$0xff] }
 0x763   :  { %6049 = vrcp.f32 %v2064_v5  ;;  %v2354_v5 = vld [vmem:[#allocation9 + $0x8] sm:$0xff] }
 0x764   :  { %6051 = vrcp.f32 %v2074_v26  ;;  %v2351_v26 = vld [vmem:[#allocation8 + $0x50] sm:$0xff]  ;;  %v6689_v6 = vpack.c.bf16 %v2354_v5, %v2353_v4 }
 0x76d   :  { %v6050_v8 = vpop.eup %6049 }
 0x76e   :  { %v6052_v10 = vpop.eup %6051  ;;  %v2080_v11 = vmul.f32 %v6050_v8, %v2078_v7  ;;  %v2355_v8 = vld [vmem:[#allocation9 + $0x10] sm:$0xff] }
 0x76f   :  { %v2087_v12 = vmul.f32 %v6052_v10, %v2085_v9  ;;  %v2083_v15 = vsub.f32 1.0, %v6052_v10  ;;  %v2356_v9 = vld [vmem:[#allocation9 + $0x18] sm:$0xff] }
 0x770   :  { %v2081_v14 = vadd.f32 %v2080_v11, %v6491_v41  ;;  %v2358_v11 = vld [vmem:[#allocation9 + $0x20] sm:$0xff] }
 0x772   :  { %6053 = vtanh.f32 %v2081_v14  ;;  %v2363_v14 = vld [vmem:[#allocation9 + $0x40] sm:$0xff] }
 0x77c   :  { %v6054_v17 = vpop.eup %6053 }
 0x77d   :  { %v2084_v18 = vmul.f32 %v6054_v17, %v2083_v15  ;;  %v2364_v15 = vld [vmem:[#allocation9 + $0x48] sm:$0xff] }
 0x77f   :  { %v6663_v21 = vadd.f32 %v2087_v12, %v2084_v18  ;;  %v2359_v12 = vld [vmem:[#allocation9 + $0x28] sm:$0xff]  ;;  %v2360_v18 = vld [vmem:[#allocation9 + $0x30] sm:$0xff] }
 0x780   :  { %v6702_v17 = vpack.c.bf16 %v2359_v12, %v2358_v11 }
 0x781   :  { %2089 = vst.msk [vmem:[#allocation2 + $0x8] sm:$0x30] %vm1110_vm5, %v6663_v21  ;;  %v2091_v22 = vrot.slane %v6663_v21, 4 }
 0x783   :  { %5313 = vmatmul.mubr.msk.f32.vlgmr.msra.gmra.mrb[24].mxu0 %vm374_vm2, %v2091_v22  ;;  %5324 = vmatmul.mubr.msk.f32.vlgmr.msra.gmra.mrb[24].mxu1 %vm374_vm2, %v2091_v22 }
 0x784   :  { %5797 = vmatpush3.bf16.msra.mxu0 %v6450_v27  ;;  %5345 = vmatprep.mubr.msk.f32.mxu1 %vm374_vm2, %v6670_v23  ;;  %v2345_v27 = vld [vmem:[#allocation8 + $0x28] sm:$0xff] }
 0x785   :  { %5798 = vmatprep.subr.bf16.mxu0 %v6269_v16  ;;  %5334 = vmatprep.mubr.msk.f32.mxu0 %vm6270_vm1, %v6271_v25  ;;  %v5809_v32 = vpack.c.bf16 %v2345_v27, %v2344_v29  ;;  %v4731_v27 = vld [vmem:[%s6970_s7 + $0x1] ss:$0 sm:$0xff] }
 0x786   :  { %5804 = vmatpush3.bf16.msra.mxu1 %v5801_v31  ;;  %v4728_v31 = vld [vmem:[%s6970_s7] ss:$0 sm:$0xff] }
 0x787   :  { %5806 = vmatprep.subr.bf16.mxu1 %v5805_v38 }
 0x788   :  { %5800 = vmatpush3.bf16.msra.mxu0 %v6456_v30  ;;  %v2349_v30 = vld [vmem:[#allocation8 + $0x40] sm:$0xff] }
 0x789   :  { %5810 = vmatprep.subr.bf16.mxu0 %v5809_v32  ;;  %v5817_v44 = vpack.c.bf16 %v2350_v40, %v2349_v30  ;;  %v4734_v30 = vld [vmem:[%s6971_s8] ss:$0 sm:$0xff] }
 0x78a   :  { %5808 = vmatpush3.bf16.msra.mxu1 %v5805_v38 }
 0x78b   :  { %5335 = vmatmul.mubr.msk.f32.vlgmr.msra.gmra.mrb[26].mxu0 %vm374_vm2, %v2091_v22  ;;  %5818 = vmatprep.subr.bf16.mxu1 %v5817_v44  ;;  %v6706_v22 = vpack.c.bf16 %v2364_v15, %v2363_v14 }
 0x78c   :  { %5356 = vmatprep.mubr.msk.f32.mxu0 %vm374_vm2, %v6670_v23  ;;  %5812 = vmatpush3.bf16.msra.mxu0 %v5809_v32 }
 0x78d   :  { %5814 = vmatprep.subr.bf16.mxu0 %v5813_v42 }
 0x790   :  { %5816 = vmatpush3.bf16.msra.mxu0 %v5813_v42 }
 0x791   :  { %5825 = vmatprep.subr.bf16.mxu0 %v6269_v16 }
 0x856   :  { %v2160_v45 = vpop.f32.mrb[24].mxu0  ;;  %v2230_v46 = vpop.f32.mrb[24].mxu1 }
 0x857   :  { %v2305_v48 = vrot.slane %v2160_v45, 2  ;;  %v2315_v43 = vrot.slane %v2230_v46, 2  ;;  %v5314_v49 = vpop.f32.mrb[25].mxu0  ;;  %v5325_v47 = vpop.f32.mrb[25].mxu1 }
 0x859   :  { %v2307_v50 = vadd.f32 %v2305_v48, %v6484_v35  ;;  %v2317_v51 = vadd.f32 %v2315_v43, %v6486_v37  ;;  %v2332_v35 = vrot.slane %v6663_v21, 6  ;;  %v2361_v21 = vld [vmem:[#allocation9 + $0x38] sm:$0xff] }
 0x85a   :  { %v6711_v28 = vpack.c.bf16 %v2361_v21, %v2360_v18 }
 0x85b   :  { %v4724_v52 = vmul.f32 -1.442695, %v2307_v50  ;;  %v4725_v53 = vmul.f32 -1.442695, %v2317_v51 }
 0x85d   :  { %6055 = vpow2.f32 %v4724_v52 }
 0x85e   :  { %6057 = vpow2.f32 %v4725_v53  ;;  %v2300_v54 = vpop.f32.mrb[26].mxu0 }
 0x85f   :  { %v5336_v55 = vpop.f32.mrb[27].mxu0  ;;  %v2301_v59 = vadd.f32 %v6502_v58, %v2300_v54  ;;  %v2352_v58 = vld [vmem:[#allocation8 + $0x58] sm:$0xff] }
 0x860   :  { %v5821_v7 = vpack.c.bf16 %v2352_v58, %v2351_v26 }
 0x861   :  { %v2325_v60 = vrot.slane %v2301_v59, 2 }
 0x867   :  { %v6056_v62 = vpop.eup %6055 }
 0x868   :  { %v6058_v13 = vpop.eup %6057  ;;  %v2311_v56 = vadd.f32 1.0, %v6056_v62 }
 0x869   :  { %v2321_v57 = vadd.f32 1.0, %v6058_v13 }
 0x86a   :  { %6059 = vrcp.f32 %v2311_v56  ;;  %v6764_v56 = vld [vmem:[%s6971_s8 + $0x1] ss:$0 sm:$0xff] }
 0x86b   :  { %6061 = vrcp.f32 %v2321_v57 }
 0x874   :  { %v6060_v61 = vpop.eup %6059 }
 0x875   :  { %v6062_v20 = vpop.eup %6061  ;;  %v2327_v37 = vmul.f32 %v6060_v61, %v2325_v60 }
 0x876   :  { %v2334_v63 = vmul.f32 %v6062_v20, %v2332_v35  ;;  %v2330_v1 = vsub.f32 1.0, %v6062_v20 }
 0x877   :  { %v2328_v0 = vadd.f32 %v2327_v37, %v6491_v41  ;;  %v6694_v41 = vpack.c.bf16 %v2356_v9, %v2355_v8 }
 0x879   :  { %6063 = vtanh.f32 %v2328_v0 }
 0x883   :  { %v6064_v19 = vpop.eup %6063 }
 0x884   :  { %v2331_v2 = vmul.f32 %v6064_v19, %v2330_v1 }
 0x886   :  { %v2335_v3 = vadd.f32 %v2334_v63, %v2331_v2 }
 0x888   :  { %2336 = vst.msk [vmem:[#allocation2 + $0x8] sm:$0xc0] %vm1358_vm6, %v2335_v3 }
 0x88f   :  { %v2338_v10 = vld [vmem:[#allocation2 + $0x8] sm:$0xff] }
 0x890   :  { %5346 = vmatmul.mubr.msk.f32.vlgmr.msra.gmra.mrb[26].mxu1 %vm374_vm2, %v2338_v10  ;;  %5357 = vmatmul.mubr.msk.f32.vlgmr.msra.gmra.mrb[28].mxu0 %vm374_vm2, %v2338_v10 }
 0x891   :  { %5820 = vmatpush3.bf16.msra.mxu1 %v5817_v44  ;;  %5827 = vmatpush3.bf16.msra.mxu0 %v6689_v6 }
 0x892   :  { %5367 = vmatprep.mubr.msk.f32.mxu1 %vm374_vm2, %v6670_v23  ;;  %5822 = vmatprep.subr.bf16.mxu1 %v5821_v7  ;;  %v2365_v23 = vld [vmem:[#allocation9 + $0x50] sm:$0xff] }
 0x893   :  { %5828 = vmatprep.subr.bf16.mxu0 %v6269_v16  ;;  %5378 = vmatprep.mubr.msk.f32.mxu0 %vm6270_vm1, %v6271_v25  ;;  %v6717_v29 = vpack.c.bf16 %v2366_v24, %v2365_v23 }
 0x895   :  { %5824 = vmatpush3.bf16.msra.mxu1 %v5821_v7  ;;  %5830 = vmatpush3.bf16.msra.mxu0 %v6694_v41 }
 0x896   :  { %5831 = vmatprep.subr.bf16.mxu1 %v6269_v16  ;;  %5837 = vmatprep.subr.bf16.mxu0 %v6269_v16 }
 0x898   :  { %5368 = vmatmul.mubr.msk.f32.vlgmr.msra.gmra.mrb[28].mxu1 %vm374_vm2, %v2338_v10  ;;  %5379 = vmatmul.mubr.f32.vlgmr.msra.gmra.mrb[30].mxu0 %v6271_v25 }
 0x899   :  { %5833 = vmatpush3.bf16.msra.mxu1 %v6702_v17  ;;  %5389 = vmatprep.mubr.msk.f32.mxu1 %vm6270_vm1, %v6271_v25 }
 0x89a   :  { %5834 = vmatprep.subr.bf16.mxu1 %v6269_v16  ;;  %5839 = vmatpush3.bf16.msra.mxu0 %v6706_v22 }
 0x89b   :  { %5840 = vmatprep.subr.bf16.mxu0 %v6269_v16  ;;  %5400 = vmatprep.mubr.msk.f32.mxu0 %vm6270_vm1, %v6271_v25 }
 0x89d   :  { %5836 = vmatpush3.bf16.msra.mxu1 %v6711_v28 }
 0x89e   :  { %5842 = vmatpush3.bf16.msra.mxu0 %v6717_v29  ;;  %5843 = vmatprep.subr.bf16.mxu1 %v6269_v16 }
 0x89f   :  { %5849 = vmatprep.subr.bf16.mxu0 %v6269_v16 }
 0x8a0   :  { %5390 = vmatmul.mubr.f32.vlgmr.msra.gmra.mrb[30].mxu1 %v6271_v25 }
 0x8a1   :  { %5401 = vmatmul.mubr.f32.vlgmr.msra.gmra.mrb[32].mxu0 %v6271_v25  ;;  %5845 = vmatpush3.bf16.msra.mxu1 %v6689_v6 }
 0x8a2   :  { %5851 = vmatpush3.bf16.msra.mxu0 %v6702_v17  ;;  %5846 = vmatprep.subr.bf16.mxu1 %v6269_v16 }
 0x8a3   :  { %5852 = vmatprep.subr.bf16.mxu0 %v6269_v16  ;;  %5411 = vmatprep.mubr.msk.f32.mxu1 %vm6270_vm1, %v6271_v25 }
 0x8a4   :  { %5422 = vmatprep.mubr.msk.f32.mxu0 %vm6270_vm1, %v6271_v25 }
 0x8a5   :  { %5848 = vmatpush3.bf16.msra.mxu1 %v6694_v41 }
 0x8a6   :  { %5854 = vmatpush3.bf16.msra.mxu0 %v6711_v28  ;;  %5855 = vmatprep.subr.bf16.mxu1 %v6269_v16 }
 0x8a7   :  { %5861 = vmatprep.subr.bf16.mxu0 %v6269_v16 }
 0x963   :  { %v5347_v32 = vpop.f32.mrb[26].mxu1  ;;  %v5358_v33 = vpop.f32.mrb[28].mxu0 }
 0x964   :  { %v6746_v34 = vadd.f32 %v5347_v32, %v4728_v31  ;;  %v6748_v36 = vadd.f32 %v5358_v33, %v4731_v27  ;;  %v2451_v38 = vpop.f32.mrb[27].mxu1  ;;  %v2532_v39 = vpop.f32.mrb[29].mxu0 }
 0x965   :  { %v6753_v40 = vadd.f32 %v4728_v31, %v2451_v38  ;;  %v6758_v47 = vadd.f32 %v4731_v27, %v2532_v39 }
 0x96b   :  { %v5369_v42 = vpop.f32.mrb[28].mxu1  ;;  %v2688_v44 = vpop.f32.mrb[30].mxu0 }
 0x96c   :  { %v6755_v45 = vadd.f32 %v5369_v42, %v4734_v30  ;;  %v2838_v46 = vadd.f32 %v2688_v44, %v6753_v40  ;;  %v2613_v48 = vpop.f32.mrb[29].mxu1  ;;  %v5380_v43 = vpop.f32.mrb[31].mxu0 }
 0x96d   :  { %v6767_v35 = vadd.f32 %v4734_v30, %v2613_v48 }
 0x96e   :  { %v4738_v49 = vmul.f32 -1.442695, %v2838_v46 }
 0x970   :  { %6065 = vpow2.f32 %v4738_v49 }
 0x973   :  { %v2758_v50 = vpop.f32.mrb[30].mxu1 }
 0x974   :  { %v2845_v51 = vadd.f32 %v2758_v50, %v6758_v47  ;;  %v5391_v52 = vpop.f32.mrb[31].mxu1  ;;  %v2834_v53 = vpop.f32.mrb[32].mxu0 }
 0x975   :  { %v5402_v54 = vpop.f32.mrb[33].mxu0  ;;  %v2835_v60 = vadd.f32 %v6764_v56, %v2834_v53 }
 0x976   :  { %v4739_v55 = vmul.f32 -1.442695, %v2845_v51 }
 0x978   :  { %6067 = vpow2.f32 %v4739_v55 }
 0x97a   :  { %v6066_v62 = vpop.eup %6065 }
 0x97b   :  { %v2842_v13 = vadd.f32 1.0, %v6066_v62 }
 0x97d   :  { %6069 = vrcp.f32 %v2842_v13 }
 0x982   :  { %v6068_v57 = vpop.eup %6067 }
 0x983   :  { %v2849_v59 = vadd.f32 1.0, %v6068_v57 }
 0x985   :  { %6071 = vrcp.f32 %v2849_v59 }
 0x987   :  { %v6070_v61 = vpop.eup %6069 }
 0x988   :  { %v2852_v20 = vmul.f32 %v6070_v61, %v2835_v60 }
 0x98a   :  { %v2853_v37 = vadd.f32 %v2852_v20, %v6767_v35 }
 0x98c   :  { %6073 = vtanh.f32 %v2853_v37 }
 0x98f   :  { %v6072_v63 = vpop.eup %6071 }
 0x990   :  { %v2855_v0 = vsub.f32 1.0, %v6072_v63  ;;  %v2857_v2 = vmul.f32 0.0, %v6072_v63 }
 0x996   :  { %v6074_v1 = vpop.eup %6073 }
 0x997   :  { %v2856_v19 = vmul.f32 %v6074_v1, %v2855_v0 }
 0x999   :  { %v2858_v3 = vadd.f32 %v2857_v2, %v2856_v19 }
 0x99b   :  { %5412 = vmatmul.mubr.msk.f32.vlgmr.msra.gmra.mrb[32].mxu1 %vm374_vm2, %v2858_v3  ;;  %5423 = vmatmul.mubr.msk.f32.vlgmr.msra.gmra.mrb[34].mxu0 %vm374_vm2, %v2858_v3  ;;  %v3100_v33 = vrot.slane %v2858_v3, 6 }
 0x99c   :  { %5857 = vmatpush3.bf16.msra.mxu1 %v6706_v22  ;;  %5433 = vmatprep.mubr.msk.f32.mxu1 %vm6270_vm1, %v6271_v25 }
 0x99d   :  { %5858 = vmatprep.subr.bf16.mxu1 %v6269_v16  ;;  %5863 = vmatpush3.bf16.msra.mxu0 %v6689_v6 }
 0x99e   :  { %5864 = vmatprep.subr.bf16.mxu0 %v6269_v16  ;;  %5444 = vmatprep.mubr.msk.f32.mxu0 %vm6270_vm1, %v6271_v25 }
 0x9a0   :  { %5860 = vmatpush3.bf16.msra.mxu1 %v6717_v29 }
 0x9a1   :  { %5867 = vmatprep.subr.bf16.mxu1 %v6269_v16  ;;  %5866 = vmatpush3.bf16.msra.mxu0 %v6694_v41 }
 0x9a2   :  { %5873 = vmatprep.subr.bf16.mxu0 %v6269_v16 }
 0x9a3   :  { %5434 = vmatmul.mubr.msk.f32.vlgmr.msra.gmra.mrb[34].mxu1 %vm374_vm2, %v2858_v3 }
 0x9a4   :  { %5869 = vmatpush3.bf16.msra.mxu1 %v6702_v17  ;;  %5455 = vmatprep.mubr.msk.f32.mxu1 %vm6270_vm1, %v6271_v25 }
 0x9a5   :  { %5870 = vmatprep.subr.bf16.mxu1 %v6269_v16 }
 0x9a8   :  { %5872 = vmatpush3.bf16.msra.mxu1 %v6711_v28 }
 0x9a9   :  { %5879 = vmatprep.subr.bf16.mxu1 %v6269_v16 }
 0xa6e   :  { %v2928_v4 = vpop.f32.mrb[32].mxu1  ;;  %v2998_v5 = vpop.f32.mrb[34].mxu0 }
 0xa6f   :  { %v3073_v26 = vrot.slane %v2928_v4, 6  ;;  %v3083_v58 = vrot.slane %v2998_v5, 6  ;;  %v5413_v7 = vpop.f32.mrb[33].mxu1  ;;  %v5424_v8 = vpop.f32.mrb[35].mxu0 }
 0xa71   :  { %v3075_v9 = vadd.f32 %v3073_v26, %v6753_v40  ;;  %v3085_v10 = vadd.f32 %v3083_v58, %v6758_v47 }
 0xa73   :  { %v4743_v11 = vmul.f32 -1.442695, %v3075_v9  ;;  %v4744_v12 = vmul.f32 -1.442695, %v3085_v10 }
 0xa75   :  { %6075 = vpow2.f32 %v4743_v11 }
 0xa76   :  { %6077 = vpow2.f32 %v4744_v12  ;;  %v3068_v14 = vpop.f32.mrb[34].mxu1 }
 0xa77   :  { %v5435_v15 = vpop.f32.mrb[35].mxu1  ;;  %v3069_v31 = vadd.f32 %v6764_v56, %v3068_v14 }
 0xa79   :  { %v3093_v27 = vrot.slane %v3069_v31, 6 }
 0xa7f   :  { %v6076_v18 = vpop.eup %6075 }
 0xa80   :  { %v6078_v21 = vpop.eup %6077  ;;  %v3079_v23 = vadd.f32 1.0, %v6076_v18 }
 0xa81   :  { %v3089_v24 = vadd.f32 1.0, %v6078_v21 }
 0xa82   :  { %6079 = vrcp.f32 %v3079_v23 }
 0xa83   :  { %6081 = vrcp.f32 %v3089_v24 }
 0xa8c   :  { %v6080_v32 = vpop.eup %6079 }
 0xa8d   :  { %v6082_v38 = vpop.eup %6081  ;;  %v3095_v39 = vmul.f32 %v6080_v32, %v3093_v27 }
 0xa8e   :  { %v3102_v30 = vmul.f32 %v6082_v38, %v3100_v33  ;;  %v3098_v44 = vsub.f32 1.0, %v6082_v38 }
 0xa8f   :  { %v3096_v42 = vadd.f32 %v3095_v39, %v6767_v35 }
 0xa91   :  { %6083 = vtanh.f32 %v3096_v42 }
 0xa9b   :  { %v6084_v46 = vpop.eup %6083 }
 0xa9c   :  { %v3099_v48 = vmul.f32 %v6084_v46, %v3098_v44 }
 0xa9e   :  { %v3103_v43 = vadd.f32 %v3102_v30, %v3099_v48 }
 0xaa0   :  { %v3105_v49 = vrot.slane %v3103_v43, 2  ;;  %v3346_v3 = vrot.slane %v3103_v43, 6 }
 0xaa2   :  { %5445 = vmatmul.mubr.msk.f32.vlgmr.msra.gmra.mrb[36].mxu0 %vm374_vm2, %v3105_v49  ;;  %5456 = vmatmul.mubr.msk.f32.vlgmr.msra.gmra.mrb[36].mxu1 %vm374_vm2, %v3105_v49 }
 0xaa3   :  { %5875 = vmatpush3.bf16.msra.mxu0 %v6706_v22  ;;  %5466 = vmatprep.mubr.msk.f32.mxu0 %vm6270_vm1, %v6271_v25 }
 0xaa4   :  { %5876 = vmatprep.subr.bf16.mxu0 %v6269_v16  ;;  %5881 = vmatpush3.bf16.msra.mxu1 %v6689_v6 }
 0xaa5   :  { %5882 = vmatprep.subr.bf16.mxu1 %v6269_v16  ;;  %5477 = vmatprep.mubr.msk.f32.mxu1 %vm6270_vm1, %v6271_v25 }
 0xaa7   :  { %5878 = vmatpush3.bf16.msra.mxu0 %v6717_v29 }
 0xaa8   :  { %5885 = vmatprep.subr.bf16.mxu0 %v6269_v16  ;;  %5884 = vmatpush3.bf16.msra.mxu1 %v6694_v41 }
 0xaa9   :  { %5891 = vmatprep.subr.bf16.mxu1 %v6269_v16 }
 0xaaa   :  { %5467 = vmatmul.mubr.msk.f32.vlgmr.msra.gmra.mrb[38].mxu0 %vm374_vm2, %v3105_v49 }
 0xaab   :  { %5887 = vmatpush3.bf16.msra.mxu0 %v6702_v17  ;;  %5488 = vmatprep.mubr.msk.f32.mxu0 %vm6270_vm1, %v6271_v25 }
 0xaac   :  { %5888 = vmatprep.subr.bf16.mxu0 %v6269_v16 }
 0xaaf   :  { %5890 = vmatpush3.bf16.msra.mxu0 %v6711_v28 }
 0xab0   :  { %5897 = vmatprep.subr.bf16.mxu0 %v6269_v16 }
 0xb75   :  { %v3174_v50 = vpop.f32.mrb[36].mxu0  ;;  %v3244_v51 = vpop.f32.mrb[36].mxu1 }
 0xb76   :  { %v3319_v52 = vrot.slane %v3174_v50, 4  ;;  %v3329_v53 = vrot.slane %v3244_v51, 4  ;;  %v5446_v54 = vpop.f32.mrb[37].mxu0  ;;  %v5457_v55 = vpop.f32.mrb[37].mxu1 }
 0xb78   :  { %v3321_v62 = vadd.f32 %v3319_v52, %v6753_v40  ;;  %v3331_v13 = vadd.f32 %v3329_v53, %v6758_v47 }
 0xb7a   :  { %v4748_v57 = vmul.f32 -1.442695, %v3321_v62  ;;  %v4749_v59 = vmul.f32 -1.442695, %v3331_v13 }
 0xb7c   :  { %6085 = vpow2.f32 %v4748_v57 }
 0xb7d   :  { %6087 = vpow2.f32 %v4749_v59  ;;  %v3314_v60 = vpop.f32.mrb[38].mxu0 }
 0xb7e   :  { %v5468_v61 = vpop.f32.mrb[39].mxu0  ;;  %v3315_v1 = vadd.f32 %v6764_v56, %v3314_v60 }
 0xb80   :  { %v3339_v19 = vrot.slane %v3315_v1, 4 }
 0xb86   :  { %v6086_v20 = vpop.eup %6085 }
 0xb87   :  { %v6088_v37 = vpop.eup %6087  ;;  %v3325_v63 = vadd.f32 1.0, %v6086_v20 }
 0xb88   :  { %v3335_v0 = vadd.f32 1.0, %v6088_v37 }
 0xb89   :  { %6089 = vrcp.f32 %v3325_v63 }
 0xb8a   :  { %6091 = vrcp.f32 %v3335_v0 }
 0xb93   :  { %v6090_v2 = vpop.eup %6089 }
 0xb94   :  { %v6092_v4 = vpop.eup %6091  ;;  %v3341_v5 = vmul.f32 %v6090_v2, %v3339_v19 }
 0xb95   :  { %v3348_v26 = vmul.f32 %v6092_v4, %v3346_v3  ;;  %v3344_v7 = vsub.f32 1.0, %v6092_v4 }
 0xb96   :  { %v3342_v58 = vadd.f32 %v3341_v5, %v6767_v35 }
 0xb98   :  { %6093 = vtanh.f32 %v3342_v58 }
 0xba2   :  { %v6094_v8 = vpop.eup %6093 }
 0xba3   :  { %v3345_v9 = vmul.f32 %v6094_v8, %v3344_v7 }
 0xba5   :  { %v3349_v10 = vadd.f32 %v3348_v26, %v3345_v9 }
 0xba7   :  { %v3351_v11 = vrot.slane %v3349_v10, 4  ;;  %v3592_v49 = vrot.slane %v3349_v10, 6 }
 0xba9   :  { %5478 = vmatmul.mubr.msk.f32.vlgmr.msra.gmra.mrb[38].mxu1 %vm374_vm2, %v3351_v11  ;;  %5489 = vmatmul.mubr.msk.f32.vlgmr.msra.gmra.mrb[40].mxu0 %vm374_vm2, %v3351_v11 }
 0xbaa   :  { %5893 = vmatpush3.bf16.msra.mxu1 %v6706_v22  ;;  %5499 = vmatprep.mubr.msk.f32.mxu1 %vm6270_vm1, %v6271_v25 }
 0xbab   :  { %5894 = vmatprep.subr.bf16.mxu1 %v6269_v16  ;;  %5899 = vmatpush3.bf16.msra.mxu0 %v6689_v6 }
 0xbac   :  { %5900 = vmatprep.subr.bf16.mxu0 %v6269_v16  ;;  %5510 = vmatprep.mubr.msk.f32.mxu0 %vm6270_vm1, %v6271_v25 }
 0xbae   :  { %5896 = vmatpush3.bf16.msra.mxu1 %v6717_v29 }
 0xbaf   :  { %5903 = vmatprep.subr.bf16.mxu1 %v6269_v16  ;;  %5902 = vmatpush3.bf16.msra.mxu0 %v6694_v41 }
 0xbb0   :  { %5909 = vmatprep.subr.bf16.mxu0 %v6269_v16 }
 0xbb1   :  { %5500 = vmatmul.mubr.msk.f32.vlgmr.msra.gmra.mrb[40].mxu1 %vm374_vm2, %v3351_v11 }
 0xbb2   :  { %5905 = vmatpush3.bf16.msra.mxu1 %v6702_v17  ;;  %5521 = vmatprep.mubr.msk.f32.mxu1 %vm6270_vm1, %v6271_v25 }
 0xbb3   :  { %5906 = vmatprep.subr.bf16.mxu1 %v6269_v16 }
 0xbb6   :  { %5908 = vmatpush3.bf16.msra.mxu1 %v6711_v28 }
 0xbb7   :  { %5915 = vmatprep.subr.bf16.mxu1 %v6269_v16 }
 0xc7c   :  { %v3420_v12 = vpop.f32.mrb[38].mxu1  ;;  %v3490_v14 = vpop.f32.mrb[40].mxu0 }
 0xc7d   :  { %v3565_v15 = vrot.slane %v3420_v12, 2  ;;  %v3575_v18 = vrot.slane %v3490_v14, 2  ;;  %v5479_v21 = vpop.f32.mrb[39].mxu1  ;;  %v5490_v23 = vpop.f32.mrb[41].mxu0 }
 0xc7f   :  { %v3567_v24 = vadd.f32 %v3565_v15, %v6753_v40  ;;  %v3577_v31 = vadd.f32 %v3575_v18, %v6758_v47 }
 0xc81   :  { %v4753_v27 = vmul.f32 -1.442695, %v3567_v24  ;;  %v4754_v32 = vmul.f32 -1.442695, %v3577_v31 }
 0xc83   :  { %6095 = vpow2.f32 %v4753_v27 }
 0xc84   :  { %6097 = vpow2.f32 %v4754_v32  ;;  %v3560_v33 = vpop.f32.mrb[40].mxu1 }
 0xc85   :  { %v5501_v38 = vpop.f32.mrb[41].mxu1  ;;  %v3561_v46 = vadd.f32 %v6764_v56, %v3560_v33 }
 0xc87   :  { %v3585_v48 = vrot.slane %v3561_v46, 2 }
 0xc8d   :  { %v6096_v39 = vpop.eup %6095 }
 0xc8e   :  { %v6098_v30 = vpop.eup %6097  ;;  %v3571_v42 = vadd.f32 1.0, %v6096_v39 }
 0xc8f   :  { %v3581_v44 = vadd.f32 1.0, %v6098_v30 }
 0xc90   :  { %6099 = vrcp.f32 %v3571_v42 }
 0xc91   :  { %6101 = vrcp.f32 %v3581_v44 }
 0xc9a   :  { %v6100_v43 = vpop.eup %6099 }
 0xc9b   :  { %v6102_v40 = vpop.eup %6101  ;;  %v3587_v50 = vmul.f32 %v6100_v43, %v3585_v48 }
 0xc9c   :  { %v3594_v47 = vmul.f32 %v6102_v40, %v3592_v49  ;;  %v3590_v52 = vsub.f32 1.0, %v6102_v40 }
 0xc9d   :  { %v3588_v51 = vadd.f32 %v3587_v50, %v6767_v35 }
 0xc9f   :  { %6103 = vtanh.f32 %v3588_v51 }
 0xca9   :  { %v6104_v53 = vpop.eup %6103 }
 0xcaa   :  { %v3591_v54 = vmul.f32 %v6104_v53, %v3590_v52 }
 0xcac   :  { %v3595_v55 = vadd.f32 %v3594_v47, %v3591_v54 }
 0xcae   :  { %v3597_v62 = vrot.slane %v3595_v55, 6 }
 0xcb0   :  { %5511 = vmatmul.mubr.msk.f32.vlgmr.msra.gmra.mrb[42].mxu0 %vm374_vm2, %v3597_v62  ;;  %5522 = vmatmul.mubr.msk.f32.vlgmr.msra.gmra.mrb[42].mxu1 %vm374_vm2, %v3597_v62 }
 0xcb1   :  { %5911 = vmatpush3.bf16.msra.mxu0 %v6706_v22  ;;  %5532 = vmatprep.mubr.msk.f32.mxu0 %vm6270_vm1, %v6271_v25 }
 0xcb2   :  { %5912 = vmatprep.subr.bf16.mxu0 %v6269_v16  ;;  %5917 = vmatpush3.bf16.msra.mxu1 %v6689_v6 }
 0xcb3   :  { %5918 = vmatprep.subr.bf16.mxu1 %v6269_v16  ;;  %5543 = vmatprep.mubr.msk.f32.mxu1 %vm6270_vm1, %v6271_v25 }
 0xcb5   :  { %5914 = vmatpush3.bf16.msra.mxu0 %v6717_v29 }
 0xcb6   :  { %5921 = vmatprep.subr.bf16.mxu0 %v6269_v16  ;;  %5920 = vmatpush3.bf16.msra.mxu1 %v6694_v41 }
 0xcb7   :  { %5927 = vmatprep.subr.bf16.mxu1 %v6269_v16 }
 0xcb8   :  { %5533 = vmatmul.mubr.msk.f32.vlgmr.msra.gmra.mrb[44].mxu0 %vm374_vm2, %v3597_v62 }
 0xcb9   :  { %5923 = vmatpush3.bf16.msra.mxu0 %v6702_v17  ;;  %5554 = vmatprep.mubr.msk.f32.mxu0 %vm6270_vm1, %v6271_v25 }
 0xcba   :  { %5924 = vmatprep.subr.bf16.mxu0 %v6269_v16 }
 0xcbd   :  { %5926 = vmatpush3.bf16.msra.mxu0 %v6711_v28 }
 0xcbe   :  { %5933 = vmatprep.subr.bf16.mxu0 %v6269_v16 }
 0xd83   :  { %v3666_v35 = vpop.f32.mrb[42].mxu0  ;;  %v3736_v13 = vpop.f32.mrb[42].mxu1 }
 0xd84   :  { %v3810_v57 = vadd.f32 %v3666_v35, %v6746_v34  ;;  %v5512_v59 = vpop.f32.mrb[43].mxu0  ;;  %v5523_v60 = vpop.f32.mrb[43].mxu1  ;;  %v3817_v20 = vadd.f32 %v3736_v13, %v6748_v36 }
 0xd86   :  { %v4758_v61 = vmul.f32 -1.442695, %v3810_v57  ;;  %v4759_v37 = vmul.f32 -1.442695, %v3817_v20 }
 0xd88   :  { %6105 = vpow2.f32 %v4758_v61 }
 0xd89   :  { %6107 = vpow2.f32 %v4759_v37 }
 0xd8b   :  { %v3806_v63 = vpop.f32.mrb[44].mxu0 }
 0xd8c   :  { %v5534_v0 = vpop.f32.mrb[45].mxu0  ;;  %v3807_v4 = vadd.f32 %v6764_v56, %v3806_v63 }
 0xd92   :  { %v6106_v1 = vpop.eup %6105 }
 0xd93   :  { %v3814_v19 = vadd.f32 1.0, %v6106_v1  ;;  %v6108_v2 = vpop.eup %6107 }
 0xd94   :  { %v3821_v3 = vadd.f32 1.0, %v6108_v2 }
 0xd95   :  { %6109 = vrcp.f32 %v3814_v19 }
 0xd96   :  { %6111 = vrcp.f32 %v3821_v3 }
 0xd9f   :  { %v6110_v5 = vpop.eup %6109 }
 0xda0   :  { %v3824_v26 = vmul.f32 %v6110_v5, %v3807_v4  ;;  %v6112_v7 = vpop.eup %6111 }
 0xda1   :  { %v3827_v8 = vsub.f32 1.0, %v6112_v7  ;;  %v3830_v11 = vmul.f32 %v6112_v7, %v3597_v62 }
 0xda2   :  { %v3825_v58 = vadd.f32 %v3824_v26, %v6755_v45 }
 0xda4   :  { %6113 = vtanh.f32 %v3825_v58 }
 0xdae   :  { %v6114_v9 = vpop.eup %6113 }
 0xdaf   :  { %v3828_v10 = vmul.f32 %v6114_v9, %v3827_v8 }
 0xdb1   :  { %v3831_v12 = vadd.f32 %v3830_v11, %v3828_v10 }
 0xdb3   :  { %5544 = vmatmul.mubr.msk.f32.vlgmr.msra.gmra.mrb[44].mxu1 %vm374_vm2, %v3831_v12  ;;  %5555 = vmatmul.mubr.msk.f32.vlgmr.msra.gmra.mrb[46].mxu0 %vm374_vm2, %v3831_v12  ;;  %v4073_v40 = vrot.slane %v3831_v12, 6 }
 0xdb4   :  { %5929 = vmatpush3.bf16.msra.mxu1 %v6706_v22  ;;  %5565 = vmatprep.mubr.msk.f32.mxu1 %vm6270_vm1, %v6271_v25 }
 0xdb5   :  { %5930 = vmatprep.subr.bf16.mxu1 %v6269_v16  ;;  %5935 = vmatpush3.bf16.msra.mxu0 %v6689_v6 }
 0xdb6   :  { %5936 = vmatprep.subr.bf16.mxu0 %v6269_v16  ;;  %5576 = vmatprep.mubr.msk.f32.mxu0 %vm6270_vm1, %v6271_v25 }
 0xdb8   :  { %5932 = vmatpush3.bf16.msra.mxu1 %v6717_v29 }
 0xdb9   :  { %5939 = vmatprep.subr.bf16.mxu1 %v6269_v16  ;;  %5938 = vmatpush3.bf16.msra.mxu0 %v6694_v41 }
 0xdba   :  { %5945 = vmatprep.subr.bf16.mxu0 %v6269_v16 }
 0xdbb   :  { %5566 = vmatmul.mubr.msk.f32.vlgmr.msra.gmra.mrb[46].mxu1 %vm374_vm2, %v3831_v12 }
 0xdbc   :  { %5941 = vmatpush3.bf16.msra.mxu1 %v6702_v17  ;;  %5587 = vmatprep.mubr.msk.f32.mxu1 %vm6270_vm1, %v6271_v25 }
 0xdbd   :  { %5942 = vmatprep.subr.bf16.mxu1 %v6269_v16 }
 0xdc0   :  { %5944 = vmatpush3.bf16.msra.mxu1 %v6711_v28 }
 0xdc1   :  { %5951 = vmatprep.subr.bf16.mxu1 %v6269_v16 }
 0xe86   :  { %v3901_v14 = vpop.f32.mrb[44].mxu1  ;;  %v3971_v15 = vpop.f32.mrb[46].mxu0 }
 0xe87   :  { %v4046_v18 = vrot.slane %v3901_v14, 6  ;;  %v4056_v21 = vrot.slane %v3971_v15, 6  ;;  %v5545_v23 = vpop.f32.mrb[45].mxu1  ;;  %v5556_v24 = vpop.f32.mrb[47].mxu0 }
 0xe89   :  { %v4048_v31 = vadd.f32 %v4046_v18, %v6746_v34  ;;  %v4058_v27 = vadd.f32 %v4056_v21, %v6748_v36  ;;  %v4569_v18 = vld [vmem:[%s6972_s9] sm:$0xff]  ;;  %v4571_v21 = vld [vmem:[%s6972_s9 + $0x10] sm:$0xff] }
 0xe8b   :  { %v4763_v32 = vmul.f32 -1.442695, %v4048_v31  ;;  %v4764_v33 = vmul.f32 -1.442695, %v4058_v27 }
 0xe8d   :  { %6115 = vpow2.f32 %v4763_v32 }
 0xe8e   :  { %6117 = vpow2.f32 %v4764_v33  ;;  %v4041_v38 = vpop.f32.mrb[46].mxu1 }
 0xe8f   :  { %v5567_v39 = vpop.f32.mrb[47].mxu1  ;;  %v4042_v48 = vadd.f32 %v6764_v56, %v4041_v38 }
 0xe91   :  { %v4066_v43 = vrot.slane %v4042_v48, 6 }
 0xe97   :  { %v6116_v30 = vpop.eup %6115 }
 0xe98   :  { %v6118_v42 = vpop.eup %6117  ;;  %v4052_v44 = vadd.f32 1.0, %v6116_v30 }
 0xe99   :  { %v4062_v46 = vadd.f32 1.0, %v6118_v42 }
 0xe9a   :  { %6119 = vrcp.f32 %v4052_v44 }
 0xe9b   :  { %6121 = vrcp.f32 %v4062_v46 }
 0xea4   :  { %v6120_v49 = vpop.eup %6119 }
 0xea5   :  { %v6122_v50 = vpop.eup %6121  ;;  %v4068_v47 = vmul.f32 %v6120_v49, %v4066_v43 }
 0xea6   :  { %v4075_v51 = vmul.f32 %v6122_v50, %v4073_v40  ;;  %v4071_v53 = vsub.f32 1.0, %v6122_v50 }
 0xea7   :  { %v4069_v52 = vadd.f32 %v4068_v47, %v6755_v45 }
 0xea9   :  { %6123 = vtanh.f32 %v4069_v52 }
 0xeb3   :  { %v6124_v54 = vpop.eup %6123 }
 0xeb4   :  { %v4072_v55 = vmul.f32 %v6124_v54, %v4071_v53 }
 0xeb6   :  { %v4076_v62 = vadd.f32 %v4075_v51, %v4072_v55 }
 0xeb8   :  { %v4078_v35 = vrot.slane %v4076_v62, 2  ;;  %v4319_v26 = vrot.slane %v4076_v62, 6 }
 0xeba   :  { %5577 = vmatmul.mubr.msk.f32.vlgmr.msra.gmra.mrb[48].mxu0 %vm374_vm2, %v4078_v35  ;;  %5588 = vmatmul.mubr.msk.f32.vlgmr.msra.gmra.mrb[48].mxu1 %vm374_vm2, %v4078_v35 }
 0xebb   :  { %5947 = vmatpush3.bf16.msra.mxu0 %v6706_v22  ;;  %5598 = vmatprep.mubr.msk.f32.mxu0 %vm6270_vm1, %v6271_v25 }
 0xebc   :  { %5948 = vmatprep.subr.bf16.mxu0 %v6269_v16  ;;  %5953 = vmatpush3.bf16.msra.mxu1 %v6689_v6 }
 0xebd   :  { %5954 = vmatprep.subr.bf16.mxu1 %v6269_v16  ;;  %5609 = vmatprep.mubr.msk.f32.mxu1 %vm6270_vm1, %v6271_v25 }
 0xebf   :  { %5950 = vmatpush3.bf16.msra.mxu0 %v6717_v29 }
 0xec0   :  { %5957 = vmatprep.subr.bf16.mxu0 %v6269_v16  ;;  %5956 = vmatpush3.bf16.msra.mxu1 %v6694_v41 }
 0xec1   :  { %5963 = vmatprep.subr.bf16.mxu1 %v6269_v16 }
 0xec2   :  { %5599 = vmatmul.mubr.msk.f32.vlgmr.msra.gmra.mrb[50].mxu0 %vm374_vm2, %v4078_v35 }
 0xec3   :  { %5959 = vmatpush3.bf16.msra.mxu0 %v6702_v17  ;;  %5620 = vmatprep.mubr.msk.f32.mxu0 %vm6270_vm1, %v6271_v25 }
 0xec4   :  { %5960 = vmatprep.subr.bf16.mxu0 %v6269_v16 }
 0xec7   :  { %5962 = vmatpush3.bf16.msra.mxu0 %v6711_v28 }
 0xec8   :  { %5969 = vmatprep.subr.bf16.mxu0 %v6269_v16 }
 0xf8d   :  { %v4147_v6 = vpop.f32.mrb[48].mxu0  ;;  %v4217_v13 = vpop.f32.mrb[48].mxu1 }
 0xf8e   :  { %v4292_v57 = vrot.slane %v4147_v6, 4  ;;  %v4302_v59 = vrot.slane %v4217_v13, 4  ;;  %v5578_v41 = vpop.f32.mrb[49].mxu0  ;;  %v5589_v60 = vpop.f32.mrb[49].mxu1 }
 0xf90   :  { %v4294_v61 = vadd.f32 %v4292_v57, %v6746_v34  ;;  %v4304_v20 = vadd.f32 %v4302_v59, %v6748_v36 }
 0xf92   :  { %v4768_v17 = vmul.f32 -1.442695, %v4294_v61  ;;  %v4769_v37 = vmul.f32 -1.442695, %v4304_v20 }
 0xf94   :  { %6125 = vpow2.f32 %v4768_v17 }
 0xf95   :  { %6127 = vpow2.f32 %v4769_v37  ;;  %v4287_v63 = vpop.f32.mrb[50].mxu0 }
 0xf96   :  { %v5600_v0 = vpop.f32.mrb[51].mxu0  ;;  %v4288_v3 = vadd.f32 %v6764_v56, %v4287_v63 }
 0xf98   :  { %v4312_v4 = vrot.slane %v4288_v3, 4 }
 0xf9e   :  { %v6126_v1 = vpop.eup %6125 }
 0xf9f   :  { %v6128_v28 = vpop.eup %6127  ;;  %v4298_v19 = vadd.f32 1.0, %v6126_v1 }
 0xfa0   :  { %v4308_v2 = vadd.f32 1.0, %v6128_v28 }
 0xfa1   :  { %6129 = vrcp.f32 %v4298_v19 }
 0xfa2   :  { %6131 = vrcp.f32 %v4308_v2 }
 0xfab   :  { %v6130_v5 = vpop.eup %6129 }
 0xfac   :  { %v6132_v58 = vpop.eup %6131  ;;  %v4314_v7 = vmul.f32 %v6130_v5, %v4312_v4 }
 0xfad   :  { %v4321_v8 = vmul.f32 %v6132_v58, %v4319_v26  ;;  %v4317_v10 = vsub.f32 1.0, %v6132_v58 }
 0xfae   :  { %v4315_v9 = vadd.f32 %v4314_v7, %v6755_v45 }
 0xfb0   :  { %6133 = vtanh.f32 %v4315_v9 }
 0xfba   :  { %v6134_v11 = vpop.eup %6133 }
 0xfbb   :  { %v4318_v12 = vmul.f32 %v6134_v11, %v4317_v10 }
 0xfbd   :  { %v4322_v14 = vadd.f32 %v4321_v8, %v4318_v12 }
 0xfbf   :  { %v4324_v15 = vrot.slane %v4322_v14, 4  ;;  %v4565_v52 = vrot.slane %v4322_v14, 6 }
 0xfc1   :  { %5610 = vmatmul.mubr.msk.f32.vlgmr.msra.gmra.mrb[50].mxu1 %vm374_vm2, %v4324_v15  ;;  %5621 = vmatmul.mubr.msk.f32.vlgmr.msra.gmra.mrb[52].mxu0 %vm374_vm2, %v4324_v15 }
 0xfc2   :  { %5965 = vmatpush3.bf16.msra.mxu1 %v6706_v22  ;;  %5631 = vmatprep.mubr.msk.f32.mxu1 %vm6270_vm1, %v6271_v25  ;;  %v4570_v22 = vld [vmem:[%s6972_s9 + $0x8] sm:$0xff] }
 0xfc3   :  { %5966 = vmatprep.subr.bf16.mxu1 %v6269_v16  ;;  %5642 = vmatprep.mubr.msk.f32.mxu0 %vm6270_vm1, %v6271_v25  ;;  %v5970_v23 = vpack.c.bf16 %v4570_v22, %v4569_v18  ;;  %v4572_v25 = vld [vmem:[%s6972_s9 + $0x18] sm:$0xff] }
 0xfc5   :  { %5971 = vmatpush3.bf16.msra.mxu0 %v5970_v23 }
 0xfc6   :  { %5968 = vmatpush3.bf16.msra.mxu1 %v6717_v29  ;;  %v5973_v29 = vpack.c.bf16 %v4572_v25, %v4571_v21  ;;  %5972 = vmatprep.subr.bf16.mxu0 %v6269_v16 }
 0xfc9   :  { %5632 = vmatmul.mubr.msk.f32.vlgmr.msra.gmra.mrb[52].mxu1 %vm374_vm2, %v4324_v15  ;;  %5974 = vmatpush3.bf16.msra.mxu0 %v5973_v29 }
0x1094   :  { %v4393_v24 = vpop.f32.mrb[50].mxu1  ;;  %v4463_v31 = vpop.f32.mrb[52].mxu0 }
0x1095   :  { %v4538_v27 = vrot.slane %v4393_v24, 2  ;;  %v4548_v32 = vrot.slane %v4463_v31, 2  ;;  %v5611_v33 = vpop.f32.mrb[51].mxu1  ;;  %v5622_v38 = vpop.f32.mrb[53].mxu0 }
0x1097   :  { %v4540_v39 = vadd.f32 %v4538_v27, %v6746_v34  ;;  %v4550_v30 = vadd.f32 %v4548_v32, %v6748_v36 }
0x1099   :  { %v4773_v42 = vmul.f32 -1.442695, %v4540_v39  ;;  %v4774_v44 = vmul.f32 -1.442695, %v4550_v30 }
0x109b   :  { %6135 = vpow2.f32 %v4773_v42 }
0x109c   :  { %6137 = vpow2.f32 %v4774_v44  ;;  %v4533_v46 = vpop.f32.mrb[52].mxu1 }
0x109d   :  { %v5633_v48 = vpop.f32.mrb[53].mxu1  ;;  %v4534_v50 = vadd.f32 %v6764_v56, %v4533_v46  ;;  %v4775_v56 = vld [vmem:[%s6973_s10] ss:$0 sm:$0xff] }
0x109f   :  { %v4558_v47 = vrot.slane %v4534_v50, 2 }
0x10a5   :  { %v6136_v43 = vpop.eup %6135 }
0x10a6   :  { %v6138_v49 = vpop.eup %6137  ;;  %v4544_v16 = vadd.f32 1.0, %v6136_v43 }
0x10a7   :  { %v4554_v40 = vadd.f32 1.0, %v6138_v49 }
0x10a8   :  { %6139 = vrcp.f32 %v4544_v16 }
0x10a9   :  { %6141 = vrcp.f32 %v4554_v40 }
0x10b2   :  { %v6140_v51 = vpop.eup %6139 }
0x10b3   :  { %v6142_v34 = vpop.eup %6141  ;;  %v4560_v53 = vmul.f32 %v6140_v51, %v4558_v47 }
0x10b4   :  { %v4567_v36 = vmul.f32 %v6142_v34, %v4565_v52  ;;  %v4563_v55 = vsub.f32 1.0, %v6142_v34 }
0x10b5   :  { %v4561_v54 = vadd.f32 %v4560_v53, %v6755_v45 }
0x10b7   :  { %6143 = vtanh.f32 %v4561_v54 }
0x10c1   :  { %v6144_v62 = vpop.eup %6143 }
0x10c2   :  { %v4564_v35 = vmul.f32 %v6144_v62, %v4563_v55 }
0x10c4   :  { %v4568_v6 = vadd.f32 %v4567_v36, %v4564_v35 }
0x10c6   :  { %v4581_v13 = vrot.slane %v4568_v6, 6 }
0x10c8   :  { %5643 = vmatmul.mubr.msk.f32.vlgmr.msra.gmra.mrb[54].mxu0 %vm374_vm2, %v4581_v13 }
0x119b   :  { %v4650_v57 = vpop.f32.mrb[54].mxu0 }
0x119c   :  { %v4651_v59 = vadd.f32 %v4775_v56, %v4650_v57  ;;  %v5644_v41 = vpop.f32.mrb[55].mxu0 }
0x119e   :  { %4655 = vst.msk [vmem:[#allocation11] sm:$0x3] %vm4654_vm7, %v4651_v59 }
0x119f   :  { %6244 = shalt.err (!%p6241_p8)
}
0x11a0   :  { %s6245_s21 = scalar_lea.hbm %s6974_s11, 32 }
0x11a1   :  { %p6246_p9 = scmp.ne.s32.totalorder %s6974_s11, %s6245_s21  ;;  %p6249_p10 = scmp.lt.u32.totalorder %s6245_s21, %s6974_s11 }
0x11a3   :  { %p6251_p11 = pnand %p6249_p10, %p6246_p9 }
0x11a5   :  { %6254 = shalt.err (!%p6251_p11)
}
0x11a6   :  { %4665 = dma.vmem_to_hbm [thread:$0]  %s4663_s0, 32, %s6974_s11, [#allocation5]  }
0x11a7   :  { %6261 = dma.done.wait [#allocation5], 32  }
0x11a8   :  { %6262 = vsyncadd [#allocation5], 4294967264 }
0x11a9   :  { %4669 = vsyncpa [#allocation4], 1 }
0x11aa   :  { %4670 = vsyncpa [#allocation7], 1 }
0x11ab   :  { %4671 = vsyncpa [#allocation10], 1 }
0x11ac   :  { %4672 = vsyncpa [#allocation5], 1 }

</bundles_post_ra>
